<compile_context>
chip_gen: v5e
topology: v5e:2x2
jax: 0.10.0
libtpu: 0.0.40
codegen_flags: <defaults>
</compile_context>

<pallas_src>
import numpy as np
import jax
import jax.numpy as jnp
from jax.experimental import pallas as pl
from jax.experimental.pallas import tpu as pltpu

BN_EPS = 1e-5


# ----------------------------- parameters -----------------------------------
def _bn_params(key, c):
    k1, k2, k3, k4 = jax.random.split(key, 4)
    gamma = (1.0 + 0.1 * jax.random.normal(k1, (c,))).astype(jnp.float32)
    beta = (0.1 * jax.random.normal(k2, (c,))).astype(jnp.float32)
    mean = (0.1 * jax.random.normal(k3, (c,))).astype(jnp.float32)
    var = (0.5 + jax.random.uniform(k4, (c,))).astype(jnp.float32)
    return gamma, beta, mean, var


def init_params(key, g_in_channels, x_in_channels):
    Cg, Cx = g_in_channels, x_in_channels
    ks = jax.random.split(key, 16)

    def nrm(k, shape, s=0.3):
        return (s * jax.random.normal(k, shape)).astype(jnp.float32)

    return {
        # g_block: Conv2d(Cg, Cx, 1) + BN(Cx)
        "wg": nrm(ks[0], (Cx, Cg, 1, 1)), "bg": nrm(ks[1], (Cx,), 0.1),
        "g_bn": _bn_params(ks[2], Cx),
        # x_block: Conv2d(Cx, Cx, 1, stride=2) + BN(Cx)
        "wx": nrm(ks[3], (Cx, Cx, 1, 1)), "bx": nrm(ks[4], (Cx,), 0.1),
        "x_bn": _bn_params(ks[5], Cx),
        # psi_block: Conv2d(Cx, 1, 1) + BN(1)
        "wpsi": nrm(ks[6], (1, Cx, 1, 1)), "bpsi": nrm(ks[7], (1,), 0.1),
        "psi_bn": _bn_params(ks[8], 1),
        # resampler: ConvTranspose2d(1, Cx, kernel=2, stride=2)
        "wt": nrm(ks[9], (1, Cx, 2, 2)), "bt": nrm(ks[10], (Cx,), 0.1),
        # resampler_conv: ConvBlock(Cx, Cx, 3, pad=1) (bias=False) + BN(Cx)
        "wc1": nrm(ks[11], (Cx, Cx, 3, 3)), "c1_bn": _bn_params(ks[12], Cx),
        "wc2": nrm(ks[13], (Cx, Cx, 3, 3)), "c2_bn": _bn_params(ks[14], Cx),
        "o_bn": _bn_params(ks[15], Cx),
    }


# ------------------------------ Pallas path ----------------------------------
def attention_gate_pallas(g_nchw, x_nchw, params):
    N, Cg, Hh, Wh = g_nchw.shape
    _, Cx, H, W = x_nchw.shape
    assert H == 2 * Hh and W == 2 * Wh, "g must be at half the spatial size of x"
    HW = H * W
    f32 = jnp.float32

    # ---- wrapper glue: pure indexing / layout + parameter folding ------------
    def up2_flat(t):  # (N, C, Hh, Wh) -> nearest 2x2 replicate -> (N, C, HW)
        return jnp.repeat(jnp.repeat(t, 2, axis=2), 2, axis=3) \
                  .reshape(t.shape[0], t.shape[1], HW)

    g_up = up2_flat(g_nchw.astype(f32))                        # (N, Cg, HW)
    xs_up = up2_flat(x_nchw[:, :, ::2, ::2].astype(f32))       # (N, Cx, HW)
    x_flat = x_nchw.astype(f32).reshape(N, Cx, HW)             # (N, Cx, HW)

    def bn_fold(bn):
        gamma, beta, mean, var = bn
        scale = (gamma / jnp.sqrt(var + BN_EPS)).astype(f32)
        shift = (beta - mean * scale).astype(f32)
        return scale, shift

    g_s, g_b = bn_fold(params["g_bn"])
    x_s, x_b = bn_fold(params["x_bn"])
    p_s, p_b = bn_fold(params["psi_bn"])
    c1_s, c1_b = bn_fold(params["c1_bn"])
    c2_s, c2_b = bn_fold(params["c2_bn"])
    o_s, o_b = bn_fold(params["o_bn"])

    # Fold BN affines into the adjacent 1x1 convs (conv -> BN, no nonlinearity).
    wg_f = g_s[:, None] * params["wg"][:, :, 0, 0].astype(f32)      # (Cx, Cg)
    bg_f = g_s * params["bg"].astype(f32) + g_b                     # (Cx,)
    wx_f = x_s[:, None] * params["wx"][:, :, 0, 0].astype(f32)      # (Cx, Cx)
    bx_f = x_s * params["bx"].astype(f32) + x_b                     # (Cx,)
    wp_f = p_s[:, None] * params["wpsi"][:, :, 0, 0].astype(f32)    # (1, Cx)
    bp_f = p_s * params["bpsi"].astype(f32) + p_b                   # (1,)

    wsm = jnp.concatenate([wg_f, wx_f], axis=1)                     # (Cx, Cg+Cx)

    # ConvTranspose2d(1->Cx, k=2, s=2): per-pixel tap tile, wt_full[c, h*W+w] =
    # wt[c, h%2, w%2] (only O(Cx*HW) data, no one-hot operator).
    wt_full = jnp.tile(params["wt"][0].astype(f32), (1, Hh, Wh)).reshape(Cx, HW)
    bt = params["bt"].astype(f32)                                   # (Cx,)

    # 3x3 conv weights in im2col layout with the BN scale folded into rows:
    #   wcat[o, k*Cx + i] = scale[o] * W_torch[o, i, kh, kw],  k = kh*3 + kw.
    def conv_w_cat(w, scale):
        wc = jnp.transpose(w.astype(f32), (0, 2, 3, 1)).reshape(Cx, 9 * Cx)
        return scale[:, None] * wc

    wconv = jnp.concatenate([conv_w_cat(params["wc1"], c1_s),
                             conv_w_cat(params["wc2"], c2_s)], axis=1)  # (Cx,18Cx)

    # Per-channel bias/affine slab: one column per vector so the kernel reads
    # lane slices (Cx, 1) that broadcast over (Cx, HW).
    vec = jnp.zeros((Cx, 8), f32)
    vec = vec.at[:, 0].set(bg_f + bx_f)   # folded g+x bias (pre-relu sum)
    vec = vec.at[:, 1].set(bt)            # resampler bias
    vec = vec.at[:, 2].set(c1_b)          # conv1 folded BN shift
    vec = vec.at[:, 3].set(c2_b)          # conv2 folded BN shift
    vec = vec.at[:, 4].set(o_s)           # trailing o_bn scale
    vec = vec.at[:, 5].set(o_b)           # trailing o_bn shift
    vec = vec.at[:, 6].set(wp_f[0])       # psi weights (as a column)
    vec = vec.at[0, 7].set(bp_f[0])       # psi folded bias (scalar, row 0)

    # Flat-spatial roll amounts + edge-validity mask slab for the 9 taps
    # ('same' padding). mask_cat[k*Cx + i] == mask of tap k (centre tap = 1s).
    pos = np.arange(HW)
    py, px = pos // W, pos % W
    shifts, masks = [], []
    for kh in range(3):
        for kw in range(3):
            dy, dx = kh - 1, kw - 1
            shifts.append(int((-(dy * W + dx)) % HW))           # lane-roll amount
            valid = (py + dy >= 0) & (py + dy < H) & (px + dx >= 0) & (px + dx < W)
            masks.append(valid.astype(np.float32))
    mask_cat = jnp.asarray(np.repeat(np.stack(masks), Cx, axis=0))  # (9*Cx, HW)

    # ------------------------------ kernel ------------------------------------
    def kernel(g_ref, xs_ref, x_ref, wsm_ref, vec_ref, wt_ref, wconv_ref,
               mask_ref, out_ref):
        gv = g_ref[0]         # (Cg, HW)  nearest-upsampled g
        xsv = xs_ref[0]       # (Cx, HW)  nearest-upsampled strided x
        xv = x_ref[0]         # (Cx, HW)
        wsm = wsm_ref[...]    # (Cx, Cg+Cx)
        vec = vec_ref[...]    # (Cx, 8)
        wcv = wconv_ref[...]  # (Cx, 18*Cx)
        mask = mask_ref[...]  # (9*Cx, HW)

        # -- gating branch: exact-f32 VPU rank-1 broadcast-FMAs (no MXU) -------
        s = vec[:, 0:1]                                   # (Cx,1) folded bias
        for i in range(Cg):
            s = s + wsm[:, i:i + 1] * gv[i:i + 1, :]
        for j in range(Cx):
            s = s + wsm[:, Cg + j:Cg + j + 1] * xsv[j:j + 1, :]
        s = jnp.maximum(s, 0.0)                           # relu(sigma1), (Cx,HW)

        psi = vec[0:1, 7:8]                               # folded psi bias (1,1)
        for o in range(Cx):
            psi = psi + vec[o:o + 1, 6:7] * s[o:o + 1, :]
        # sigmoid via EUP exp + approximate EUP reciprocal (no VALU divide).
        sigma2 = pl.reciprocal(1.0 + jnp.exp(-psi), approx=True)   # (1, HW)

        # resampler: alpha = upsampled sigma2 * per-pixel tap weight + bias.
        alpha = sigma2 * wt_ref[...] + vec[:, 1:2]        # (Cx, HW)
        y = alpha * xv

        # -- 3x3 'same' convs: im2col stack (rolls + one mask) + ONE matmul ----
        def conv3x3(inp, w):                              # w: (Cx, 9*Cx)
            pieces = [inp if sh == 0 else pltpu.roll(inp, sh, axis=1)
                      for sh in shifts]
            col = jnp.concatenate(pieces, axis=0) * mask  # (9*Cx, HW)
            # HIGHEST kept only on these 2 dots per step (M=Cx=4, K=9*Cx): a
            # handful of vmatmul passes, keeps the result f32-exact. Switch to
            # default precision when scaling Cx / HW to production sizes.
            return jnp.dot(w, col, preferred_element_type=jnp.float32,
                           precision=jax.lax.Precision.HIGHEST)

        h1 = jnp.maximum(conv3x3(y, wcv[:, :9 * Cx]) + vec[:, 2:3], 0.0)
        h2 = jnp.maximum(conv3x3(h1, wcv[:, 9 * Cx:]) + vec[:, 3:4], 0.0)
        out_ref[0] = (h2 * vec[:, 4:5] + vec[:, 5:6]).astype(out_ref.dtype)

    batched = [g_up, xs_up, x_flat]
    consts = [wsm, vec, wt_full, wconv, mask_cat]

    in_specs = [pl.BlockSpec((1,) + tuple(a.shape[1:]), lambda n: (n, 0, 0))
                for a in batched]
    in_specs += [pl.BlockSpec(tuple(a.shape), lambda n: (0, 0)) for a in consts]

    out = pl.pallas_call(
        kernel,
        out_shape=jax.ShapeDtypeStruct((N, Cx, HW), f32),
        grid_spec=pltpu.PrefetchScalarGridSpec(
            num_scalar_prefetch=0,
            grid=(N,),
            in_specs=in_specs,
            out_specs=pl.BlockSpec((1, Cx, HW), lambda n: (n, 0, 0)),
        ),
        compiler_params=pltpu.CompilerParams(
            dimension_semantics=("parallel",)),
    )(*batched, *consts)

    return out.reshape(N, Cx, H, W)                        # already NCHW


# -------------------------- pure-JAX reference -------------------------------
def _bn_eval(x, bn):
    gamma, beta, mean, var = bn
    scale = gamma / jnp.sqrt(var + BN_EPS)
    shift = beta - mean * scale
    return x * scale[None, :, None, None] + shift[None, :, None, None]


def _conv2d(x, w, b=None, stride=1, padding=0):
    out = jax.lax.conv_general_dilated(
        x, w, window_strides=(stride, stride),
        padding=[(padding, padding), (padding, padding)],
        dimension_numbers=("NCHW", "OIHW", "NCHW"),
        precision=jax.lax.Precision.HIGHEST)
    if b is not None:
        out = out + b[None, :, None, None]
    return out


def attention_gate_reference(g, x, p):
    w_g = _bn_eval(_conv2d(g, p["wg"], p["bg"]), p["g_bn"])
    w_x = _bn_eval(_conv2d(x, p["wx"], p["bx"], stride=2), p["x_bn"])
    s = jax.nn.relu(w_g + w_x)
    psi = _bn_eval(_conv2d(s, p["wpsi"], p["bpsi"]), p["psi_bn"])
    sigma2 = jax.nn.sigmoid(psi)                           # (N, 1, Hh, Wh)
    N, _, Hh, Wh = sigma2.shape
    Cx = p["wt"].shape[1]
    sig_e = sigma2[:, 0][:, None, :, None, :, None]        # (N,1,Hh,1,Wh,1)
    wt_e = p["wt"][0][None, :, None, :, None, :]           # (1,Cx,1,2,1,2)
    alpha = (sig_e * wt_e).reshape(N, Cx, 2 * Hh, 2 * Wh) \
        + p["bt"][None, :, None, None]
    y = alpha * x
    h1 = jax.nn.relu(_bn_eval(_conv2d(y, p["wc1"], padding=1), p["c1_bn"]))
    h2 = jax.nn.relu(_bn_eval(_conv2d(h1, p["wc2"], padding=1), p["c2_bn"]))
    return _bn_eval(h2, p["o_bn"])


# ---------------------------------- main --------------------------------------
if __name__ == "__main__":
    key = jax.random.PRNGKey(0)
    kg, kx, kp = jax.random.split(key, 3)

    N, g_in_channels, x_in_channels, H, W = 2, 8, 4, 16, 16
    g = jax.random.normal(kg, (N, g_in_channels, H // 2, W // 2), dtype=jnp.float32)
    x = jax.random.normal(kx, (N, x_in_channels, H, W), dtype=jnp.float32)
    params = init_params(kp, g_in_channels, x_in_channels)

    out = attention_gate_pallas(g, x, params)
    out = jax.block_until_ready(out)

    ref = attention_gate_reference(g, x, params)
    np.testing.assert_allclose(np.asarray(out), np.asarray(ref),
                               atol=1e-2, rtol=1e-2)
    print("KERNEL_OK")
</pallas_src>

<mosaic_0001>
module attributes {stable_mosaic.version = 11 : i64} {
  func.func @kernel(%arg0: i32, %arg1: memref<1x8x256xf32, #tpu.memory_space<vmem>>, %arg2: memref<1x4x256xf32, #tpu.memory_space<vmem>>, %arg3: memref<1x4x256xf32, #tpu.memory_space<vmem>>, %arg4: memref<4x12xf32, #tpu.memory_space<vmem>>, %arg5: memref<4x8xf32, #tpu.memory_space<vmem>>, %arg6: memref<4x256xf32, #tpu.memory_space<vmem>>, %arg7: memref<4x72xf32, #tpu.memory_space<vmem>>, %arg8: memref<36x256xf32, #tpu.memory_space<vmem>>, %arg9: memref<1x4x256xf32, #tpu.memory_space<vmem>>) attributes {dimension_semantics = [#tpu.dimension_semantics<parallel>], iteration_bounds = array<i64: 2>, scalar_prefetch = 0 : i64, scratch_operands = 0 : i64, tpu.core_type = #tpu.core_type<tc>, window_params = [{transform_indices = @transform_0, window_bounds = array<i64: 1, 8, 256>}, {transform_indices = @transform_1, window_bounds = array<i64: 1, 4, 256>}, {transform_indices = @transform_2, window_bounds = array<i64: 1, 4, 256>}, {pipeline_mode = #tpu.pipeline_mode<synchronous>, transform_indices = @transform_3, window_bounds = array<i64: 4, 12>}, {pipeline_mode = #tpu.pipeline_mode<synchronous>, transform_indices = @transform_4, window_bounds = array<i64: 4, 8>}, {pipeline_mode = #tpu.pipeline_mode<synchronous>, transform_indices = @transform_5, window_bounds = array<i64: 4, 256>}, {pipeline_mode = #tpu.pipeline_mode<synchronous>, transform_indices = @transform_6, window_bounds = array<i64: 4, 72>}, {pipeline_mode = #tpu.pipeline_mode<synchronous>, transform_indices = @transform_7, window_bounds = array<i64: 36, 256>}, {transform_indices = @transform_8, window_bounds = array<i64: 1, 4, 256>}]} {
    %c0 = arith.constant 0 : index
    %c0_0 = arith.constant 0 : index
    %c0_1 = arith.constant 0 : index
    %0 = vector.load %arg1[%c0, %c0_0, %c0_1] : memref<1x8x256xf32, #tpu.memory_space<vmem>>, vector<1x8x256xf32>
    %1 = vector.shape_cast %0 : vector<1x8x256xf32> to vector<8x256xf32>
    %c0_2 = arith.constant 0 : index
    %c0_3 = arith.constant 0 : index
    %c0_4 = arith.constant 0 : index
    %2 = vector.load %arg2[%c0_2, %c0_3, %c0_4] : memref<1x4x256xf32, #tpu.memory_space<vmem>>, vector<1x4x256xf32>
    %3 = vector.shape_cast %2 : vector<1x4x256xf32> to vector<4x256xf32>
    %c0_5 = arith.constant 0 : index
    %c0_6 = arith.constant 0 : index
    %c0_7 = arith.constant 0 : index
    %4 = vector.load %arg3[%c0_5, %c0_6, %c0_7] : memref<1x4x256xf32, #tpu.memory_space<vmem>>, vector<1x4x256xf32>
    %5 = vector.shape_cast %4 : vector<1x4x256xf32> to vector<4x256xf32>
    %c0_8 = arith.constant 0 : index
    %c0_9 = arith.constant 0 : index
    %6 = vector.load %arg4[%c0_8, %c0_9] : memref<4x12xf32, #tpu.memory_space<vmem>>, vector<4x12xf32>
    %c0_10 = arith.constant 0 : index
    %c0_11 = arith.constant 0 : index
    %7 = vector.load %arg5[%c0_10, %c0_11] : memref<4x8xf32, #tpu.memory_space<vmem>>, vector<4x8xf32>
    %c0_12 = arith.constant 0 : index
    %c0_13 = arith.constant 0 : index
    %8 = vector.load %arg7[%c0_12, %c0_13] : memref<4x72xf32, #tpu.memory_space<vmem>>, vector<4x72xf32>
    %c0_14 = arith.constant 0 : index
    %c0_15 = arith.constant 0 : index
    %9 = vector.load %arg8[%c0_14, %c0_15] : memref<36x256xf32, #tpu.memory_space<vmem>>, vector<36x256xf32>
    %10 = vector.extract_strided_slice %7 {offsets = [0, 0], sizes = [4, 1], strides = [1, 1]} : vector<4x8xf32> to vector<4x1xf32>
    %11 = vector.extract_strided_slice %6 {offsets = [0, 0], sizes = [4, 1], strides = [1, 1]} : vector<4x12xf32> to vector<4x1xf32>
    %12 = vector.extract_strided_slice %1 {offsets = [0, 0], sizes = [1, 256], strides = [1, 1]} : vector<8x256xf32> to vector<1x256xf32>
    %13 = vector.broadcast %11 : vector<4x1xf32> to vector<4x256xf32>
    %14 = vector.broadcast %12 : vector<1x256xf32> to vector<4x256xf32>
    %15 = arith.mulf %13, %14 : vector<4x256xf32>
    %16 = vector.broadcast %10 : vector<4x1xf32> to vector<4x256xf32>
    %17 = arith.addf %16, %15 : vector<4x256xf32>
    %18 = vector.extract_strided_slice %6 {offsets = [0, 1], sizes = [4, 1], strides = [1, 1]} : vector<4x12xf32> to vector<4x1xf32>
    %19 = vector.extract_strided_slice %1 {offsets = [1, 0], sizes = [1, 256], strides = [1, 1]} : vector<8x256xf32> to vector<1x256xf32>
    %20 = vector.broadcast %18 : vector<4x1xf32> to vector<4x256xf32>
    %21 = vector.broadcast %19 : vector<1x256xf32> to vector<4x256xf32>
    %22 = arith.mulf %20, %21 : vector<4x256xf32>
    %23 = arith.addf %17, %22 : vector<4x256xf32>
    %24 = vector.extract_strided_slice %6 {offsets = [0, 2], sizes = [4, 1], strides = [1, 1]} : vector<4x12xf32> to vector<4x1xf32>
    %25 = vector.extract_strided_slice %1 {offsets = [2, 0], sizes = [1, 256], strides = [1, 1]} : vector<8x256xf32> to vector<1x256xf32>
    %26 = vector.broadcast %24 : vector<4x1xf32> to vector<4x256xf32>
    %27 = vector.broadcast %25 : vector<1x256xf32> to vector<4x256xf32>
    %28 = arith.mulf %26, %27 : vector<4x256xf32>
    %29 = arith.addf %23, %28 : vector<4x256xf32>
    %30 = vector.extract_strided_slice %6 {offsets = [0, 3], sizes = [4, 1], strides = [1, 1]} : vector<4x12xf32> to vector<4x1xf32>
    %31 = vector.extract_strided_slice %1 {offsets = [3, 0], sizes = [1, 256], strides = [1, 1]} : vector<8x256xf32> to vector<1x256xf32>
    %32 = vector.broadcast %30 : vector<4x1xf32> to vector<4x256xf32>
    %33 = vector.broadcast %31 : vector<1x256xf32> to vector<4x256xf32>
    %34 = arith.mulf %32, %33 : vector<4x256xf32>
    %35 = arith.addf %29, %34 : vector<4x256xf32>
    %36 = vector.extract_strided_slice %6 {offsets = [0, 4], sizes = [4, 1], strides = [1, 1]} : vector<4x12xf32> to vector<4x1xf32>
    %37 = vector.extract_strided_slice %1 {offsets = [4, 0], sizes = [1, 256], strides = [1, 1]} : vector<8x256xf32> to vector<1x256xf32>
    %38 = vector.broadcast %36 : vector<4x1xf32> to vector<4x256xf32>
    %39 = vector.broadcast %37 : vector<1x256xf32> to vector<4x256xf32>
    %40 = arith.mulf %38, %39 : vector<4x256xf32>
    %41 = arith.addf %35, %40 : vector<4x256xf32>
    %42 = vector.extract_strided_slice %6 {offsets = [0, 5], sizes = [4, 1], strides = [1, 1]} : vector<4x12xf32> to vector<4x1xf32>
    %43 = vector.extract_strided_slice %1 {offsets = [5, 0], sizes = [1, 256], strides = [1, 1]} : vector<8x256xf32> to vector<1x256xf32>
    %44 = vector.broadcast %42 : vector<4x1xf32> to vector<4x256xf32>
    %45 = vector.broadcast %43 : vector<1x256xf32> to vector<4x256xf32>
    %46 = arith.mulf %44, %45 : vector<4x256xf32>
    %47 = arith.addf %41, %46 : vector<4x256xf32>
    %48 = vector.extract_strided_slice %6 {offsets = [0, 6], sizes = [4, 1], strides = [1, 1]} : vector<4x12xf32> to vector<4x1xf32>
    %49 = vector.extract_strided_slice %1 {offsets = [6, 0], sizes = [1, 256], strides = [1, 1]} : vector<8x256xf32> to vector<1x256xf32>
    %50 = vector.broadcast %48 : vector<4x1xf32> to vector<4x256xf32>
    %51 = vector.broadcast %49 : vector<1x256xf32> to vector<4x256xf32>
    %52 = arith.mulf %50, %51 : vector<4x256xf32>
    %53 = arith.addf %47, %52 : vector<4x256xf32>
    %54 = vector.extract_strided_slice %6 {offsets = [0, 7], sizes = [4, 1], strides = [1, 1]} : vector<4x12xf32> to vector<4x1xf32>
    %55 = vector.extract_strided_slice %1 {offsets = [7, 0], sizes = [1, 256], strides = [1, 1]} : vector<8x256xf32> to vector<1x256xf32>
    %56 = vector.broadcast %54 : vector<4x1xf32> to vector<4x256xf32>
    %57 = vector.broadcast %55 : vector<1x256xf32> to vector<4x256xf32>
    %58 = arith.mulf %56, %57 : vector<4x256xf32>
    %59 = arith.addf %53, %58 : vector<4x256xf32>
    %60 = vector.extract_strided_slice %6 {offsets = [0, 8], sizes = [4, 1], strides = [1, 1]} : vector<4x12xf32> to vector<4x1xf32>
    %61 = vector.extract_strided_slice %3 {offsets = [0, 0], sizes = [1, 256], strides = [1, 1]} : vector<4x256xf32> to vector<1x256xf32>
    %62 = vector.broadcast %60 : vector<4x1xf32> to vector<4x256xf32>
    %63 = vector.broadcast %61 : vector<1x256xf32> to vector<4x256xf32>
    %64 = arith.mulf %62, %63 : vector<4x256xf32>
    %65 = arith.addf %59, %64 : vector<4x256xf32>
    %66 = vector.extract_strided_slice %6 {offsets = [0, 9], sizes = [4, 1], strides = [1, 1]} : vector<4x12xf32> to vector<4x1xf32>
    %67 = vector.extract_strided_slice %3 {offsets = [1, 0], sizes = [1, 256], strides = [1, 1]} : vector<4x256xf32> to vector<1x256xf32>
    %68 = vector.broadcast %66 : vector<4x1xf32> to vector<4x256xf32>
    %69 = vector.broadcast %67 : vector<1x256xf32> to vector<4x256xf32>
    %70 = arith.mulf %68, %69 : vector<4x256xf32>
    %71 = arith.addf %65, %70 : vector<4x256xf32>
    %72 = vector.extract_strided_slice %6 {offsets = [0, 10], sizes = [4, 1], strides = [1, 1]} : vector<4x12xf32> to vector<4x1xf32>
    %73 = vector.extract_strided_slice %3 {offsets = [2, 0], sizes = [1, 256], strides = [1, 1]} : vector<4x256xf32> to vector<1x256xf32>
    %74 = vector.broadcast %72 : vector<4x1xf32> to vector<4x256xf32>
    %75 = vector.broadcast %73 : vector<1x256xf32> to vector<4x256xf32>
    %76 = arith.mulf %74, %75 : vector<4x256xf32>
    %77 = arith.addf %71, %76 : vector<4x256xf32>
    %78 = vector.extract_strided_slice %6 {offsets = [0, 11], sizes = [4, 1], strides = [1, 1]} : vector<4x12xf32> to vector<4x1xf32>
    %79 = vector.extract_strided_slice %3 {offsets = [3, 0], sizes = [1, 256], strides = [1, 1]} : vector<4x256xf32> to vector<1x256xf32>
    %80 = vector.broadcast %78 : vector<4x1xf32> to vector<4x256xf32>
    %81 = vector.broadcast %79 : vector<1x256xf32> to vector<4x256xf32>
    %82 = arith.mulf %80, %81 : vector<4x256xf32>
    %83 = arith.addf %77, %82 : vector<4x256xf32>
    %cst = arith.constant 0.000000e+00 : f32
    %84 = vector.broadcast %cst : f32 to vector<4x256xf32>
    %85 = arith.maximumf %83, %84 : vector<4x256xf32>
    %86 = vector.extract_strided_slice %7 {offsets = [0, 7], sizes = [1, 1], strides = [1, 1]} : vector<4x8xf32> to vector<1x1xf32>
    %87 = vector.extract_strided_slice %7 {offsets = [0, 6], sizes = [1, 1], strides = [1, 1]} : vector<4x8xf32> to vector<1x1xf32>
    %88 = vector.extract_strided_slice %85 {offsets = [0, 0], sizes = [1, 256], strides = [1, 1]} : vector<4x256xf32> to vector<1x256xf32>
    %89 = vector.broadcast %87 : vector<1x1xf32> to vector<1x256xf32>
    %90 = arith.mulf %89, %88 : vector<1x256xf32>
    %91 = vector.broadcast %86 : vector<1x1xf32> to vector<1x256xf32>
    %92 = arith.addf %91, %90 : vector<1x256xf32>
    %93 = vector.extract_strided_slice %7 {offsets = [1, 6], sizes = [1, 1], strides = [1, 1]} : vector<4x8xf32> to vector<1x1xf32>
    %94 = vector.extract_strided_slice %85 {offsets = [1, 0], sizes = [1, 256], strides = [1, 1]} : vector<4x256xf32> to vector<1x256xf32>
    %95 = vector.broadcast %93 : vector<1x1xf32> to vector<1x256xf32>
    %96 = arith.mulf %95, %94 : vector<1x256xf32>
    %97 = arith.addf %92, %96 : vector<1x256xf32>
    %98 = vector.extract_strided_slice %7 {offsets = [2, 6], sizes = [1, 1], strides = [1, 1]} : vector<4x8xf32> to vector<1x1xf32>
    %99 = vector.extract_strided_slice %85 {offsets = [2, 0], sizes = [1, 256], strides = [1, 1]} : vector<4x256xf32> to vector<1x256xf32>
    %100 = vector.broadcast %98 : vector<1x1xf32> to vector<1x256xf32>
    %101 = arith.mulf %100, %99 : vector<1x256xf32>
    %102 = arith.addf %97, %101 : vector<1x256xf32>
    %103 = vector.extract_strided_slice %7 {offsets = [3, 6], sizes = [1, 1], strides = [1, 1]} : vector<4x8xf32> to vector<1x1xf32>
    %104 = vector.extract_strided_slice %85 {offsets = [3, 0], sizes = [1, 256], strides = [1, 1]} : vector<4x256xf32> to vector<1x256xf32>
    %105 = vector.broadcast %103 : vector<1x1xf32> to vector<1x256xf32>
    %106 = arith.mulf %105, %104 : vector<1x256xf32>
    %107 = arith.addf %102, %106 : vector<1x256xf32>
    %cst_16 = arith.constant 0.000000e+00 : f32
    %108 = vector.broadcast %cst_16 : f32 to vector<1x256xf32>
    %109 = arith.subf %108, %107 : vector<1x256xf32>
    %110 = math.exp %109 : vector<1x256xf32>
    %cst_17 = arith.constant 1.000000e+00 : f32
    %111 = vector.broadcast %cst_17 : f32 to vector<1x256xf32>
    %112 = arith.addf %111, %110 : vector<1x256xf32>
    %113 = tpu.reciprocal %112 {approx = true} : vector<1x256xf32> -> vector<1x256xf32>
    %c0_18 = arith.constant 0 : index
    %c0_19 = arith.constant 0 : index
    %114 = vector.load %arg6[%c0_18, %c0_19] : memref<4x256xf32, #tpu.memory_space<vmem>>, vector<4x256xf32>
    %115 = vector.broadcast %113 : vector<1x256xf32> to vector<4x256xf32>
    %116 = arith.mulf %115, %114 : vector<4x256xf32>
    %117 = vector.extract_strided_slice %7 {offsets = [0, 1], sizes = [4, 1], strides = [1, 1]} : vector<4x8xf32> to vector<4x1xf32>
    %118 = vector.broadcast %117 : vector<4x1xf32> to vector<4x256xf32>
    %119 = arith.addf %116, %118 : vector<4x256xf32>
    %120 = arith.mulf %119, %5 : vector<4x256xf32>
    %121 = vector.extract_strided_slice %8 {offsets = [0, 0], sizes = [4, 36], strides = [1, 1]} : vector<4x72xf32> to vector<4x36xf32>
    %c17_i32 = arith.constant 17 : i32
    %122 = tpu.dynamic_rotate %120 by %c17_i32 dim 1 : vector<4x256xf32>, i32 -> vector<4x256xf32>
    %c16_i32 = arith.constant 16 : i32
    %123 = tpu.dynamic_rotate %120 by %c16_i32 dim 1 : vector<4x256xf32>, i32 -> vector<4x256xf32>
    %c15_i32 = arith.constant 15 : i32
    %124 = tpu.dynamic_rotate %120 by %c15_i32 dim 1 : vector<4x256xf32>, i32 -> vector<4x256xf32>
    %c1_i32 = arith.constant 1 : i32
    %125 = tpu.dynamic_rotate %120 by %c1_i32 dim 1 : vector<4x256xf32>, i32 -> vector<4x256xf32>
    %c255_i32 = arith.constant 255 : i32
    %126 = tpu.dynamic_rotate %120 by %c255_i32 dim 1 : vector<4x256xf32>, i32 -> vector<4x256xf32>
    %c241_i32 = arith.constant 241 : i32
    %127 = tpu.dynamic_rotate %120 by %c241_i32 dim 1 : vector<4x256xf32>, i32 -> vector<4x256xf32>
    %c240_i32 = arith.constant 240 : i32
    %128 = tpu.dynamic_rotate %120 by %c240_i32 dim 1 : vector<4x256xf32>, i32 -> vector<4x256xf32>
    %c239_i32 = arith.constant 239 : i32
    %129 = tpu.dynamic_rotate %120 by %c239_i32 dim 1 : vector<4x256xf32>, i32 -> vector<4x256xf32>
    %130 = tpu.concatenate %122, %123, %124, %125, %120, %126, %127, %128, %129 in 0 : vector<4x256xf32>, vector<4x256xf32>, vector<4x256xf32>, vector<4x256xf32>, vector<4x256xf32>, vector<4x256xf32>, vector<4x256xf32>, vector<4x256xf32>, vector<4x256xf32> -> vector<36x256xf32>
    %131 = arith.mulf %130, %9 : vector<36x256xf32>
    %cst_20 = arith.constant dense<0.000000e+00> : vector<4x256xf32>
    %132 = tpu.matmul %121, %131, %cst_20 {dimension_numbers = #tpu.dot_dimension_numbers<[1], [0], [0], [1], [0, 0, 1, 1], [], []>, precision = #tpu.contract_precision<fp32>} : vector<4x36xf32>, vector<36x256xf32>, vector<4x256xf32> -> vector<4x256xf32>
    %133 = vector.extract_strided_slice %7 {offsets = [0, 2], sizes = [4, 1], strides = [1, 1]} : vector<4x8xf32> to vector<4x1xf32>
    %134 = vector.broadcast %133 : vector<4x1xf32> to vector<4x256xf32>
    %135 = arith.addf %132, %134 : vector<4x256xf32>
    %cst_21 = arith.constant 0.000000e+00 : f32
    %136 = vector.broadcast %cst_21 : f32 to vector<4x256xf32>
    %137 = arith.maximumf %135, %136 : vector<4x256xf32>
    %138 = vector.extract_strided_slice %8 {offsets = [0, 36], sizes = [4, 36], strides = [1, 1]} : vector<4x72xf32> to vector<4x36xf32>
    %c17_i32_22 = arith.constant 17 : i32
    %139 = tpu.dynamic_rotate %137 by %c17_i32_22 dim 1 : vector<4x256xf32>, i32 -> vector<4x256xf32>
    %c16_i32_23 = arith.constant 16 : i32
    %140 = tpu.dynamic_rotate %137 by %c16_i32_23 dim 1 : vector<4x256xf32>, i32 -> vector<4x256xf32>
    %c15_i32_24 = arith.constant 15 : i32
    %141 = tpu.dynamic_rotate %137 by %c15_i32_24 dim 1 : vector<4x256xf32>, i32 -> vector<4x256xf32>
    %c1_i32_25 = arith.constant 1 : i32
    %142 = tpu.dynamic_rotate %137 by %c1_i32_25 dim 1 : vector<4x256xf32>, i32 -> vector<4x256xf32>
    %c255_i32_26 = arith.constant 255 : i32
    %143 = tpu.dynamic_rotate %137 by %c255_i32_26 dim 1 : vector<4x256xf32>, i32 -> vector<4x256xf32>
    %c241_i32_27 = arith.constant 241 : i32
    %144 = tpu.dynamic_rotate %137 by %c241_i32_27 dim 1 : vector<4x256xf32>, i32 -> vector<4x256xf32>
    %c240_i32_28 = arith.constant 240 : i32
    %145 = tpu.dynamic_rotate %137 by %c240_i32_28 dim 1 : vector<4x256xf32>, i32 -> vector<4x256xf32>
    %c239_i32_29 = arith.constant 239 : i32
    %146 = tpu.dynamic_rotate %137 by %c239_i32_29 dim 1 : vector<4x256xf32>, i32 -> vector<4x256xf32>
    %147 = tpu.concatenate %139, %140, %141, %142, %137, %143, %144, %145, %146 in 0 : vector<4x256xf32>, vector<4x256xf32>, vector<4x256xf32>, vector<4x256xf32>, vector<4x256xf32>, vector<4x256xf32>, vector<4x256xf32>, vector<4x256xf32>, vector<4x256xf32> -> vector<36x256xf32>
    %148 = arith.mulf %147, %9 : vector<36x256xf32>
    %cst_30 = arith.constant dense<0.000000e+00> : vector<4x256xf32>
    %149 = tpu.matmul %138, %148, %cst_30 {dimension_numbers = #tpu.dot_dimension_numbers<[1], [0], [0], [1], [0, 0, 1, 1], [], []>, precision = #tpu.contract_precision<fp32>} : vector<4x36xf32>, vector<36x256xf32>, vector<4x256xf32> -> vector<4x256xf32>
    %150 = vector.extract_strided_slice %7 {offsets = [0, 3], sizes = [4, 1], strides = [1, 1]} : vector<4x8xf32> to vector<4x1xf32>
    %151 = vector.broadcast %150 : vector<4x1xf32> to vector<4x256xf32>
    %152 = arith.addf %149, %151 : vector<4x256xf32>
    %cst_31 = arith.constant 0.000000e+00 : f32
    %153 = vector.broadcast %cst_31 : f32 to vector<4x256xf32>
    %154 = arith.maximumf %152, %153 : vector<4x256xf32>
    %155 = vector.extract_strided_slice %7 {offsets = [0, 4], sizes = [4, 1], strides = [1, 1]} : vector<4x8xf32> to vector<4x1xf32>
    %156 = vector.broadcast %155 : vector<4x1xf32> to vector<4x256xf32>
    %157 = arith.mulf %154, %156 : vector<4x256xf32>
    %158 = vector.extract_strided_slice %7 {offsets = [0, 5], sizes = [4, 1], strides = [1, 1]} : vector<4x8xf32> to vector<4x1xf32>
    %159 = vector.broadcast %158 : vector<4x1xf32> to vector<4x256xf32>
    %160 = arith.addf %157, %159 : vector<4x256xf32>
    %c0_32 = arith.constant 0 : index
    %c0_33 = arith.constant 0 : index
    %c0_34 = arith.constant 0 : index
    %161 = vector.load %arg9[%c0_32, %c0_33, %c0_34] : memref<1x4x256xf32, #tpu.memory_space<vmem>>, vector<1x4x256xf32>
    %162 = vector.shape_cast %161 : vector<1x4x256xf32> to vector<4x256xf32>
    %163 = vector.shape_cast %160 : vector<4x256xf32> to vector<1x4x256xf32>
    tpu.vector_store %arg9[%c0_32, %c0_33, %c0_34], %163 {strides = array<i32>} : memref<1x4x256xf32, #tpu.memory_space<vmem>>, vector<1x4x256xf32>,
    return
  }
  func.func @transform_0(%arg0: i32) -> (i32, i32, i32) {
    %c0_i32 = arith.constant 0 : i32
    %c0_i32_0 = arith.constant 0 : i32
    %c0_i32_1 = arith.constant 0 : i32
    return %arg0, %c0_i32, %c0_i32_0 : i32, i32, i32
  }
  func.func @transform_1(%arg0: i32) -> (i32, i32, i32) {
    %c0_i32 = arith.constant 0 : i32
    %c0_i32_0 = arith.constant 0 : i32
    %c0_i32_1 = arith.constant 0 : i32
    return %arg0, %c0_i32, %c0_i32_0 : i32, i32, i32
  }
  func.func @transform_2(%arg0: i32) -> (i32, i32, i32) {
    %c0_i32 = arith.constant 0 : i32
    %c0_i32_0 = arith.constant 0 : i32
    %c0_i32_1 = arith.constant 0 : i32
    return %arg0, %c0_i32, %c0_i32_0 : i32, i32, i32
  }
  func.func @transform_3(%arg0: i32) -> (i32, i32) {
    %c0_i32 = arith.constant 0 : i32
    %c0_i32_0 = arith.constant 0 : i32
    %c0_i32_1 = arith.constant 0 : i32
    return %c0_i32, %c0_i32_0 : i32, i32
  }
  func.func @transform_4(%arg0: i32) -> (i32, i32) {
    %c0_i32 = arith.constant 0 : i32
    %c0_i32_0 = arith.constant 0 : i32
    %c0_i32_1 = arith.constant 0 : i32
    return %c0_i32, %c0_i32_0 : i32, i32
  }
  func.func @transform_5(%arg0: i32) -> (i32, i32) {
    %c0_i32 = arith.constant 0 : i32
    %c0_i32_0 = arith.constant 0 : i32
    %c0_i32_1 = arith.constant 0 : i32
    return %c0_i32, %c0_i32_0 : i32, i32
  }
  func.func @transform_6(%arg0: i32) -> (i32, i32) {
    %c0_i32 = arith.constant 0 : i32
    %c0_i32_0 = arith.constant 0 : i32
    %c0_i32_1 = arith.constant 0 : i32
    return %c0_i32, %c0_i32_0 : i32, i32
  }
  func.func @transform_7(%arg0: i32) -> (i32, i32) {
    %c0_i32 = arith.constant 0 : i32
    %c0_i32_0 = arith.constant 0 : i32
    %c0_i32_1 = arith.constant 0 : i32
    return %c0_i32, %c0_i32_0 : i32, i32
  }
  func.func @transform_8(%arg0: i32) -> (i32, i32, i32) {
    %c0_i32 = arith.constant 0 : i32
    %c0_i32_0 = arith.constant 0 : i32
    %c0_i32_1 = arith.constant 0 : i32
    return %arg0, %c0_i32, %c0_i32_0 : i32, i32, i32
  }
}

</mosaic_0001>

<bundles_post_ra>
// kernel: tpu_custom_call.1
= control target key start
LH: loop header
LB: loop body
LE: loop exit
PB: predicated region body
PF: predicated region fallthrough
CT: control target
= control target key end

     0   :  { %s3134_s0 = inlined_call_operand.hbm [shape: f32[2,8,256], index: 0, kind: input, shape index: {}]   ;;  %s3135_s1 = inlined_call_operand.hbm [shape: f32[2,4,256], index: 1, kind: input, shape index: {}]   ;;  %s3136_s2 = inlined_call_operand.hbm [shape: f32[2,4,256], index: 2, kind: input, shape index: {}]   ;;  %s3137_s3 = inlined_call_operand.hbm [shape: f32[4,12], index: 3, kind: input, shape index: {}]   ;;  %s3138_s4 = inlined_call_operand.hbm [shape: f32[4,8], index: 4, kind: input, shape index: {}]   ;;  %s3139_s5 = inlined_call_operand.hbm [shape: f32[4,256], index: 5, kind: input, shape index: {}]   ;;  %s3140_s6 = inlined_call_operand.vmem [shape: f32[4,72], index: 6, kind: input, shape index: {}]   ;;  %s3141_s7 = inlined_call_operand.hbm [shape: f32[36,256], index: 7, kind: input, shape index: {}]   ;;  %s3142_s8 = inlined_call_operand.hbm [shape: f32[2,4,256], index: 8, kind: output, shape index: {}]  }
   0x1   :  { %3150 = sst [smem:[#allocation25_spill]] %s3135_s1 }
   0x2   :  { %3151 = sst [smem:[#allocation26_spill]] %s3137_s3 }
   0x3   :  { %3152 = sst [smem:[#allocation27_spill]] %s3138_s4 }
   0x4   :  { %3153 = sst [smem:[#allocation28_spill]] %s3139_s5 }
   0x5   :  { %3154 = sst [smem:[#allocation29_spill]] %s3141_s7 }
   0x6   :  { %13 = vsyncpa [#allocation3], 0 }
   0x7   :  { %15 = vsyncpa [#allocation3 + $0x1], 0 }
   0x8   :  { %16 = vsyncpa [#allocation6], 0 }
   0x9   :  { %18 = vsyncpa [#allocation6 + $0x1], 0 }
   0xa   :  { %19 = vsyncpa [#allocation9], 0 }
   0xb   :  { %20 = vsyncpa [#allocation12], 0 }
   0xc   :  { %21 = vsyncpa [#allocation4], 0 }
   0xd   :  { %23 = vsyncpa [#allocation4 + $0x1], 0  ;;  %s2434_s27 = smov 0   ;;  %s2436_s28 = smov 0  }
   0xe   :  { %s2438_s29 = smov 0   ;;  %s2440_s30 = smov 0  }
   0xf LB: > { %3155 = sst [smem:[#allocation20_spill]] %s2348_s27  ;;  %s2458_s12 = sadd.s32 4294967295, %s2360_s30   ;;  %s2360_s30 = sphi %s2440_s30, %s3179_s30   ;;  %s2356_s29 = sphi %s2438_s29, %s3181_s29   ;;  %s2352_s28 = sphi %s2436_s28, %s3183_s28   ;;  %s2348_s27 = sphi %s2434_s27, %s3182_s27  }
  0x10   : > { %3156 = sst [smem:[#allocation21_spill]] %s2356_s29  ;;  %p1892_p0 = scmp.ge.s32.totalorder %s2360_s30, 1 }
  0x11   : > { %s3157_s3 = sld [smem:[#allocation26_spill]]  ;;  %p3148_p1 = scmp.eq.s32.totalorder %s2458_s12, 0 }
  0x12   : > { %p243_p2 = scmp.lt.s32.totalorder %s2360_s30, 3  ;;  %s2362_s14 = smov [#allocation8]  }
  0x13   : > { %s257_s15 = sshll.u32 %s2362_s14, 4  ;;  %s3159_s5 = sld [smem:[#allocation28_spill]]  ;;  %s258_s15 = int_to_ptr.vmem [resolvable:$true] %s257_s15 }
  0x14   : > { %p2463_p3 = pnand %p1892_p0, %p243_p2  ;;  %s2363_s20 = smov [#allocation11]  }
  0x15   : > { %s281_s21 = sshll.u32 %s2363_s20, 4  ;;  %s1891_s22 = sadd.s32 4294967294, %s2360_s30   ;;  %s282_s21 = int_to_ptr.vmem [resolvable:$true] %s281_s21 }
  0x16   : > { %p1949_p5 = pneg %p2463_p3  ;;  %s2485_s23 = sadd.s32 1, %s2360_s30  }
  0x17   : > { %s255_s11 = sshll.u32 %s3157_s3, 4  ;;  %3161 = sst [smem:[#allocation22_spill]] %s2485_s23  ;;  %s256_s11 = int_to_ptr.hbm [resolvable:$true] %s255_s11 }
  0x18   : > { %p2475_p6 = pnand %p1949_p5, %p3148_p1  ;;  %s33_s24 = ssub.s32 %s2360_s30, %s2485_s23 }
  0x19   : > { %s279_s18 = sshll.u32 %s3159_s5, 4  ;;  %s36_s25 = sadd.s32 1, %s2356_s29  ;;  %s280_s18 = int_to_ptr.hbm [resolvable:$true] %s279_s18 }
  0x1a   : > { %1952 = dma.hbm_to_vmem [thread:$0]  (!%p2475_p6), %s256_s11, 64, %s258_s15, [#allocation9]  }
  0x1b   : > { %1958 = dma.hbm_to_vmem [thread:$0]  (!%p2475_p6), %s280_s18, 128, %s282_s21, [#allocation12]  }
  0x1c   : > { %p34_p7 = scmp.eq.s32.totalorder %s33_s24, 0  ;;  %p43_p8 = scmp.ne.s32.totalorder %s2356_s29, %s2352_s28 }
  0x1d   : > { %p44_p9 = scmp.eq.s32.totalorder %s2360_s30, 0  ;;  %p49_p10 = scmp.ne.s32.totalorder %s2352_s28, %s2348_s27 }
  0x1e   : > { %s2496_s26 = scalar_select %p34_p7, %s2356_s29, %s36_s25  }
  0x1f   : > { %p45_p11 = por %p44_p9, %p43_p8  ;;  %p2500_p12 = por %p3148_p1, %p49_p10 }
  0x20   : > { %3162 = sst [smem:[#allocation23_spill]] %s2496_s26  ;;  %p230_p13 = scmp.eq.s32.totalorder %s2458_s12, 1 }
  0x21   : > { %p236_p0 = scmp.eq.s32.totalorder %s1891_s22, 1  ;;  %p1980_p2 = scmp.lt.s32.totalorder %s2360_s30, 2 }
  0x22   : > { %s2507_s10 = sand.u32 1, %s2356_s29   ;;  %p2509_p5 = por %p230_p13, %p43_p8 }
  0x23   : > { %p2513_p4 = por %p236_p0, %p49_p10  ;;  %p2517_p7 = pnand %p1980_p2, %p45_p11 }
  0x24   : > { %s329_s16 = sand.u32 1, %s2360_s30   ;;  %s3149_s17 = sshll.u32 %s2507_s10, 3 }
  0x25   : > { %s3165_s14 = scalar_select %p2513_p4, 1, 0 }
  0x26   : > { %s1922_s18 = sshll.u32 %s2360_s30, 3  ;;  %s333_s20 = scalar_lea.vmem [#allocation5], %s3149_s17 }
  0x27   : > { %3166 = sst [smem:[#allocation24_spill]] %s3165_s14  ;;  %s342_s21 = sshll.u32 %s333_s20, 4  ;;  %s343_s21 = int_to_ptr.vmem [resolvable:$true] %s342_s21 }
  0x28   : > { %s3168_s1 = sld [smem:[#allocation25_spill]]  ;;  %s2532_s29 = scalar_lea.hbm %s3136_s2, %s1922_s18 }
  0x29   : > { %s2534_s23 = scalar_lea.sflag [#allocation6], %s329_s16  ;;  %p2136_p9 = pneg %p2517_p7 }
  0x2e   : > { %s338_s25 = scalar_lea.hbm %s3168_s1, %s1922_s18  ;;  %s2139_s24 = scalar_lea.hbm %s3168_s1, 16 }
  0x2f   : > { %s340_s3 = sshll.u32 %s338_s25, 4  ;;  %s341_s3 = int_to_ptr.hbm [resolvable:$true] %s340_s3 }
  0x30   : > { %s2132_s14 = sshra.s32 %s341_s3, 4  ;;  %s2133_s14 = int_to_ptr.hbm [resolvable:$true] %s2132_s14 }
  0x31   : > { %s2134_s27 = scalar_lea.hbm %s2133_s14, 8  ;;  %p2140_p13 = scmp.lt.s32.totalorder %s2133_s14, %s3168_s1 }
  0x32   : > { %p2135_p8 = scmp.ne.s32.totalorder %s2133_s14, %s2134_s27  ;;  %p2141_p0 = scmp.lt.s32.totalorder %s2139_s24, %s2134_s27 }
  0x34   : > { %p2137_p10 = pnand %p2136_p9, %p2135_p8  ;;  %p2142_p2 = por %p2141_p0, %p2140_p13 }
  0x36   : > { %p2138_p11 = pneg %p2137_p10 }
  0x38   : > { %p2143_p1 = pnand %p2142_p2, %p2138_p11 }
  0x3a   : > { %2146 = shalt.err (!%p2143_p1)
}
  0x3b   : > { %1968 = dma.hbm_to_vmem [thread:$0]  (!%p2517_p7), %s341_s3, 128, %s343_s21, %s2534_s23  }
  0x3c   : > { %s3169_s4 = sld [smem:[#allocation27_spill]]  ;;  %s2364_s20 = smov [#allocation10]  }
  0x3d   : > { %s269_s22 = sshll.u32 %s2364_s20, 4  ;;  %s3170_s7 = sld [smem:[#allocation29_spill]]  ;;  %s270_s22 = int_to_ptr.vmem [resolvable:$true] %s269_s22 }
  0x3e   : > { %s2365_s25 = smov [#allocation13]   ;;  %s2366_s21 = smov 256  }
  0x3f   : > { %s295_s3 = sshll.u32 %s2365_s25, 4  ;;  %s2367_s5 = smov 16   ;;  %s296_s3 = int_to_ptr.vmem [resolvable:$true] %s295_s3 }
  0x40   : > { %s1898_s26 = sshll.u32 %s2507_s10, 4  ;;  %s1921_s16 = sshll.u32 %s2360_s30, 4 }
  0x41   : > { %s318_s27 = scalar_lea.hbm %s3134_s0, %s1921_s16  ;;  %s313_s14 = scalar_lea.vmem [#allocation2], %s1898_s26 }
  0x42   : > { %s267_s18 = sshll.u32 %s3169_s4, 4  ;;  %s322_s1 = sshll.u32 %s313_s14, 4  ;;  %s268_s18 = int_to_ptr.hbm [resolvable:$true] %s267_s18  ;;  %s323_s1 = int_to_ptr.vmem [resolvable:$true] %s322_s1 }
  0x43   : > { %s293_s24 = sshll.u32 %s3170_s7, 4  ;;  %s310_s4 = scalar_lea.sflag [#allocation3], %s2507_s10  ;;  %s294_s24 = int_to_ptr.hbm [resolvable:$true] %s293_s24 }
  0x44   : > { %1955 = dma.hbm_to_vmem [thread:$0]  (!%p2475_p6), %s268_s18, 64, %s270_s22, [#allocation9]  }
  0x45   : > { %1961 = dma.hbm_to_vmem [thread:$0]  (!%p2475_p6), %s294_s24, 1280, %s296_s3, [#allocation12], %s2366_s21, %s2366_s21, %s2367_s5  }
  0x46   : > { %s320_s18 = sshll.u32 %s318_s27, 4  ;;  %s360_s22 = sshll.u32 %s2532_s29, 4  ;;  %s321_s18 = int_to_ptr.hbm [resolvable:$true] %s320_s18  ;;  %s361_s22 = int_to_ptr.hbm [resolvable:$true] %s360_s22 }
  0x47   : > { %s2222_s25 = sshra.s32 %s321_s18, 4  ;;  %s2229_s17 = scalar_lea.hbm %s3134_s0, 32  ;;  %s2223_s25 = int_to_ptr.hbm [resolvable:$true] %s2222_s25 }
  0x48   : > { %s2224_s7 = scalar_lea.hbm %s2223_s25, 16  ;;  %p2230_p10 = scmp.lt.s32.totalorder %s2223_s25, %s3134_s0 }
  0x49   : > { %p2225_p1 = scmp.ne.s32.totalorder %s2223_s25, %s2224_s7  ;;  %p2231_p11 = scmp.lt.s32.totalorder %s2229_s17, %s2224_s7 }
  0x4b   : > { %p2227_p6 = pnand %p2225_p1, %p2136_p9  ;;  %p2232_p13 = por %p2231_p11, %p2230_p10 }
  0x4d   : > { %p2228_p8 = pneg %p2227_p6 }
  0x4f   : > { %p2233_p0 = pnand %p2232_p13, %p2228_p8 }
  0x51   : > { %2236 = shalt.err (!%p2233_p0)
}
  0x52   : > { %1965 = dma.hbm_to_vmem [thread:$0]  (!%p2517_p7), %s321_s18, 256, %s323_s1, %s310_s4  }
  0x53   : > { %s3171_s29 = sshll.u32 %s2507_s10, 3  ;;  %s2252_s16 = sshra.s32 %s361_s22, 4  ;;  %s2253_s16 = int_to_ptr.hbm [resolvable:$true] %s2252_s16 }
  0x54   : > { %s353_s5 = scalar_lea.vmem [#allocation7], %s3171_s29  ;;  %s2254_s20 = scalar_lea.hbm %s2253_s16, 8 }
  0x55   : > { %s362_s26 = sshll.u32 %s353_s5, 4  ;;  %p2255_p2 = scmp.ne.s32.totalorder %s2253_s16, %s2254_s20  ;;  %s363_s26 = int_to_ptr.vmem [resolvable:$true] %s362_s26 }
  0x56   : > { %s2259_s14 = scalar_lea.hbm %s3136_s2, 16  ;;  %p2260_p8 = scmp.lt.s32.totalorder %s2253_s16, %s3136_s2 }
  0x57   : > { %p2257_p1 = pnand %p2255_p2, %p2136_p9  ;;  %p2261_p10 = scmp.lt.s32.totalorder %s2259_s14, %s2254_s20 }
  0x59   : > { %p2258_p6 = pneg %p2257_p1  ;;  %p2262_p11 = por %p2261_p10, %p2260_p8 }
  0x5b   : > { %p2263_p13 = pnand %p2262_p11, %p2258_p6 }
  0x5d   : > { %2266 = shalt.err (!%p2263_p13)
}
  0x5e   : > { %1971 = dma.hbm_to_vmem [thread:$0]  (!%p2517_p7), %s361_s22, 128, %s363_s26, %s2534_s23  }
  0x5f   : > { %371 = sbr.rel (%p2463_p3) target bundleno = 954 (0x3ba), region = 52  ;;  %s2595_s1 = sand.u32 (!%p2463_p3), 1, %s2352_s28  }
  0x60   : > { %s1908_s4 = sshll.u32 (!%p2463_p3), %s2595_s1, 4  ;;  %s374_s10 = scalar_lea.sflag (!%p2463_p3), [#allocation3], %s2595_s1 }
  0x61   : > { %s2599_s18 = scalar_lea.vmem (!%p2463_p3), [#allocation2], %s1908_s4 }
  0x64   : > { %2327 = dma.done.wait (%p2500_p12), %s374_s10, 256  }
  0x65   : > { %2329 = vsyncadd (%p2500_p12), %s374_s10, 4294967040  ;;  %s383_s13 = sand.u32 1, %s2458_s12   ;;  %s2607_s23 = sshll.u32 %s2595_s1, 3 }
  0x66   : > { %s384_s15 = scalar_lea.sflag [#allocation6], %s383_s13  ;;  %s387_s22 = scalar_lea.vmem [#allocation5], %s2607_s23 }
  0x67   : > { %2331 = dma.done.wait (%p2500_p12), %s384_s15, 256  }
  0x68   : > { %2333 = vsyncadd (%p2500_p12), %s384_s15, 4294967040  ;;  %s397_s24 = scalar_lea.vmem [#allocation7], %s2607_s23  ;;  %p3172_p3 = scmp.eq.s32.totalorder %s2458_s12, 0 }
  0x6a   : > { %2335 = dma.done.wait (%p3172_p3), [#allocation9], 128   ;;  %p3173_p7 = pmov %p3172_p3 }
  0x6b   : > { %p3174_p9 = pmov %p3172_p3 }
  0x6c   : > { %2337 = vsyncadd (%p3173_p7), [#allocation9], 4294967168 }
  0x6d   : > { %2339 = dma.done.wait (%p3174_p9), [#allocation12], 1408   ;;  %p3175_p0 = pmov %p3172_p3 }
  0x6e   : > { %v2368_v0 = vmov 1   ;;  %v2369_v1 = vmov 0   ;;  %v2370_v2 = vmov 3   ;;  %v465_v3 = vld [vmem:[#allocation8] sm:$0xf]  ;;  %v2371_v5 = vmov 2  }
  0x6f   : > { %2341 = vsyncadd (%p3175_p0), [#allocation12], 4294965888  ;;  %2046 = vset.pattern.permute.xlu1 %v2368_v0  ;;  %2045 = vset.pattern.permute.xlu0 %v2369_v1  ;;  %v2624_v4 = vld [vmem:[#allocation10] sm:$0xf]  ;;  %v2372_v6 = vmov 4   ;;  %v2373_v7 = vmov 5  }
  0x70   : > { %2048 = vset.pattern.permute.xlu2 %v2370_v2  ;;  %495 = vperm.xlu1 %2046, %v465_v3   ;;  %v2374_v8 = vmov 6   ;;  %v2375_v9 = vmov 7   ;;  %v2376_v10 = vmov 10   ;;  %v2377_v11 = vmov 8   ;;  %v461_v16 = vld [vmem:[%s2599_s18] sm:$0xff]  ;;  %v462_v17 = vld [vmem:[%s2599_s18 + $0x8] sm:$0xff] }
  0x71   : > { %480 = vperm.xlu0 %2045, %v465_v3   ;;  %515 = vperm.xlu2 %2048, %v465_v3   ;;  %v2378_v12 = vmov 9   ;;  %v2379_v13 = vmov 11   ;;  %v483_v19 = vperm.slane %v461_v16, 0  ;;  %v484_v20 = vperm.slane %v462_v17, 0  ;;  %v463_v55 = vld [vmem:[%s387_s22] sm:$0xff]  ;;  %s2380_s9 = smov 111  }
  0x72   : > { %v498_v21 = vperm.slane %v461_v16, 1  ;;  %v499_v22 = vperm.slane %v462_v17, 1  ;;  %v508_v25 = vperm.slane %v461_v16, 2  ;;  %v509_v26 = vperm.slane %v462_v17, 2  ;;  %s2381_s17 = smov 112   ;;  %s2382_s3 = smov 127  }
  0x73   : > { %v518_v28 = vperm.slane %v461_v16, 3  ;;  %v519_v29 = vperm.slane %v462_v17, 3  ;;  %v528_v31 = vperm.slane %v461_v16, 4  ;;  %v529_v32 = vperm.slane %v462_v17, 4  ;;  %s2383_s21 = smov 1   ;;  %s2384_s29 = smov 113  }
  0x74   : > { %v538_v48 = vperm.slane %v461_v16, 5  ;;  %v539_v49 = vperm.slane %v462_v17, 5  ;;  %v548_v52 = vperm.slane %v461_v16, 6  ;;  %v549_v53 = vperm.slane %v462_v17, 6  ;;  %s2385_s5 = smov 16   ;;  %s2386_s26 = smov 17  }
  0x75   : > { %v558_v62 = vperm.slane %v461_v16, 7  ;;  %v559_v63 = vperm.slane %v462_v17, 7  ;;  %v570_v1 = vperm.slane %v463_v55, 4  ;;  %s2387_s16 = smov 15   ;;  %vm772_vm2 = vcmask 1043456   ;;  %s2388_s27 = smov 92  }
  0x76   : > { %vm795_vm5 = vcmask 293888   ;;  %s1924_s14 = sshll.u32 %s2458_s12, 3  ;;  %s460_s10 = scalar_lea.vmem [#allocation14], %s2607_s23 }
  0x77   : > { %s1735_s4 = scalar_lea.hbm %s3142_s8, %s1924_s14  ;;  %s1737_s18 = sshll.u32 %s460_s10, 4  ;;  %s1738_s18 = int_to_ptr.vmem [resolvable:$true] %s1737_s18 }
  0x78   : > { %2047 = vset.pattern.permute.xlu1 %v2371_v5  ;;  %s1739_s13 = sshll.u32 %s1735_s4, 4  ;;  %s1724_s12 = scalar_lea.sflag [#allocation4], %s2595_s1  ;;  %s1740_s13 = int_to_ptr.hbm [resolvable:$true] %s1739_s13 }
  0x79   : > { %489 = vperm.xlu0 %2045, %v2624_v4   ;;  %505 = vperm.xlu1 %2047, %v465_v3   ;;  %s2296_s15 = sshra.s32 %s1740_s13, 4  ;;  %s2302_s23 = scalar_lea.hbm %s3142_s8, 16  ;;  %s2297_s15 = int_to_ptr.hbm [resolvable:$true] %s2296_s15 }
  0x7a   : > { %2049 = vset.pattern.permute.xlu2 %v2372_v6  ;;  %s2298_s22 = scalar_lea.hbm %s2297_s15, 8  ;;  %p2303_p6 = scmp.lt.s32.totalorder %s2297_s15, %s3142_s8 }
  0x7b   : > { %525 = vperm.xlu2 %2049, %v465_v3   ;;  %p2299_p12 = scmp.ne.s32.totalorder %s2297_s15, %s2298_s22  ;;  %p2304_p8 = scmp.lt.s32.totalorder %s2302_s23, %s2298_s22 }
  0x7d   : > { %p2300_p2 = pnand %p2299_p12, %p2509_p5  ;;  %p2305_p10 = por %p2304_p8, %p2303_p6 }
  0x7f   : > { %p2301_p1 = pneg %p2300_p2 }
  0x81   : > { %2050 = vset.pattern.permute.xlu0 %v2373_v7  ;;  %2051 = vset.pattern.permute.xlu1 %v2374_v8  ;;  %p2306_p11 = pnand %p2305_p10, %p2301_p1 }
  0x82   : > { %535 = vperm.xlu0 %2050, %v465_v3   ;;  %545 = vperm.xlu1 %2051, %v465_v3  }
  0x83   : > { %2052 = vset.pattern.permute.xlu2 %v2375_v9 }
  0x84   : > { %555 = vperm.xlu2 %2052, %v465_v3  }
  0x8a   : > { %2055 = vset.pattern.permute.xlu0 %v2376_v10  ;;  %2053 = vset.pattern.permute.xlu1 %v2377_v11  ;;  %v574_v11 = vperm.slane %v570_v1, 0 }
  0x8b   : > { %594 = vperm.xlu0 %2055, %v465_v3   ;;  %565 = vperm.xlu1 %2053, %v465_v3  }
  0x8c   : > { %2054 = vset.pattern.permute.xlu2 %v2378_v12 }
  0x8d   : > { %580 = vperm.xlu2 %2054, %v465_v3  }
  0x93   : > { %2063 = vset.pattern.permute.xlu0 %v2373_v7  ;;  %2056 = vset.pattern.permute.xlu1 %v2379_v13 }
  0x94   : > { %608 = vperm.xlu1 %2056, %v465_v3  }
  0x95   : > { %2057 = vset.pattern.permute.xlu2 %v2374_v8  ;;  %v583_v8 = vperm.slane %v463_v55, 1 }
  0x96   : > { %624 = vperm.xlu2 %2057, %v2624_v4  }
  0x9c   : > { %2058 = vset.pattern.permute.xlu1 %v2375_v9  ;;  %v584_v9 = vperm.slane %v463_v55, 5 }
  0x9d   : > { %630 = vperm.xlu1 %2058, %v2624_v4  }
  0x9e   : > { %2059 = vset.pattern.permute.xlu2 %v2368_v0  ;;  %v569_v0 = vperm.slane %v463_v55, 0 }
  0x9f   : > { %677 = vperm.xlu2 %2059, %v2624_v4  }
  0xa0   : > { %v573_v10 = vperm.slane %v569_v0, 0 }
  0xa5   : > { %2060 = vset.pattern.permute.xlu1 %v2371_v5 }
  0xa7   : > { %2062 = vset.pattern.permute.xlu2 %v2372_v6 }
  0xcb   : > { %v516_v14 = vpop.permute.xlu2 %515 }
  0xcc   : > { %v520_v42 = vmul.f32 %v518_v28, %v516_v14  ;;  %v521_v43 = vmul.f32 %v519_v29, %v516_v14 }
  0xd5   : > { %v526_v27 = vpop.permute.xlu2 %525 }
  0xd6   : > { %v530_v46 = vmul.f32 %v528_v31, %v526_v27  ;;  %v531_v47 = vmul.f32 %v529_v32, %v526_v27 }
  0xde   : > { %v556_v54 = vpop.permute.xlu2 %555 }
  0xdf   : > { %v560_v14 = vmul.f32 %v558_v62, %v556_v54 }
  0xe2   : > { %v496_v15 = vpop.permute.xlu1 %495 }
  0xe3   : > { %v481_v18 = vpop.permute.xlu0 %480  ;;  %v500_v33 = vmul.f32 %v498_v21, %v496_v15  ;;  %v501_v34 = vmul.f32 %v499_v22, %v496_v15  ;;  %v561_v15 = vmul.f32 %v559_v63, %v556_v54  ;;  %v598_v21 = vperm.slane %v463_v55, 6 }
  0xe4   : > { %v485_v23 = vmul.f32 %v483_v19, %v481_v18  ;;  %v486_v24 = vmul.f32 %v484_v20, %v481_v18  ;;  %v587_v18 = vperm.slane %v583_v8, 1  ;;  %v588_v19 = vperm.slane %v584_v9, 1 }
  0xe5   : > { %v597_v20 = vperm.slane %v463_v55, 2  ;;  %v611_v22 = vperm.slane %v463_v55, 3  ;;  %v602_v32 = vperm.slane %v598_v21, 2 }
  0xe7   : > { %v581_v16 = vpop.permute.xlu2 %580  ;;  %v601_v31 = vperm.slane %v597_v20, 2 }
  0xe8   : > { %v589_v29 = vmul.f32 %v587_v18, %v581_v16 }
  0xeb   : > { %v490_v30 = vpop.permute.xlu0 %489  ;;  %v506_v37 = vpop.permute.xlu1 %505 }
  0xec   : > { %v492_v35 = vadd.f32 %v490_v30, %v485_v23  ;;  %v493_v36 = vadd.f32 %v490_v30, %v486_v24  ;;  %v510_v38 = vmul.f32 %v508_v25, %v506_v37  ;;  %v511_v39 = vmul.f32 %v509_v26, %v506_v37  ;;  %v665_v24 = vld [vmem:[#allocation11] sm:$0xff] }
  0xed   : > { %v612_v23 = vperm.slane %v463_v55, 7  ;;  %669 = vst [vmem:[#allocation1] ss:$2 sm:$0xff] %v665_v24  ;;  %v590_v30 = vmul.f32 %v588_v19, %v581_v16 }
  0xee   : > { %v502_v40 = vadd.f32 %v500_v33, %v492_v35  ;;  %v503_v41 = vadd.f32 %v501_v34, %v493_v36  ;;  %v615_v36 = vperm.slane %v611_v22, 3 }
  0xef   : > { %v616_v37 = vperm.slane %v612_v23, 3 }
  0xf0   : > { %v512_v44 = vadd.f32 %v510_v38, %v502_v40  ;;  %v513_v45 = vadd.f32 %v511_v39, %v503_v41 }
  0xf2   : > { %v522_v50 = vadd.f32 %v520_v42, %v512_v44  ;;  %v523_v51 = vadd.f32 %v521_v43, %v513_v45  ;;  %v464_v42 = vld [vmem:[%s397_s24] sm:$0xff] }
  0xf4   : > { %v532_v56 = vadd.f32 %v530_v46, %v522_v50  ;;  %v533_v57 = vadd.f32 %v531_v47, %v523_v51  ;;  %v536_v58 = vpop.permute.xlu0 %535  ;;  %v546_v61 = vpop.permute.xlu1 %545  ;;  %v670_v43 = vld.sshfl [vmem:[#allocation1] sm:$0xff pattern:$0x75316420]  ;;  %v671_v44 = vld.sshfl [vmem:[#allocation1 + $0x8] sm:$0xff pattern:$0x75316420] }
  0xf5   : > { %v540_v59 = vmul.f32 %v538_v48, %v536_v58  ;;  %v541_v60 = vmul.f32 %v539_v49, %v536_v58  ;;  %v550_v6 = vmul.f32 %v548_v52, %v546_v61  ;;  %v551_v7 = vmul.f32 %v549_v53, %v546_v61  ;;  %683 = vst [vmem:[#allocation1] ss:$2 sm:$0xff] %v464_v42  ;;  %v625_v52 = vpop.permute.xlu2 %624  ;;  %v2676_v42 = vld [vmem:[#allocation13 + $0x20] sm:$0xff] }
  0xf7   : > { %v542_v3 = vadd.f32 %v540_v59, %v532_v56  ;;  %v543_v5 = vadd.f32 %v541_v60, %v533_v57 }
  0xf9   : > { %v552_v12 = vadd.f32 %v550_v6, %v542_v3  ;;  %v553_v13 = vadd.f32 %v551_v7, %v543_v5 }
  0xfb   : > { %v562_v25 = vadd.f32 %v560_v14, %v552_v12  ;;  %v563_v26 = vadd.f32 %v561_v15, %v553_v13 }
  0xfd   : > { %v566_v17 = vpop.permute.xlu1 %565  ;;  %v595_v35 = vpop.permute.xlu0 %594 }
  0xfe   : > { %v575_v27 = vmul.f32 %v573_v10, %v566_v17  ;;  %v576_v28 = vmul.f32 %v574_v11, %v566_v17  ;;  %v603_v40 = vmul.f32 %v601_v31, %v595_v35  ;;  %v604_v41 = vmul.f32 %v602_v32, %v595_v35  ;;  %v678_v17 = vpop.permute.xlu2 %677 }
  0xff   : > { %v694_v32 = vlaneseq }
 0x100   : > { %v577_v33 = vadd.f32 %v575_v27, %v562_v25  ;;  %v578_v34 = vadd.f32 %v576_v28, %v563_v26  ;;  %v684_v25 = vld.sshfl [vmem:[#allocation1] sm:$0xff pattern:$0x75316420]  ;;  %v685_v27 = vld.sshfl [vmem:[#allocation1 + $0x8] sm:$0xff pattern:$0x75316420] }
 0x101   : > { %v2664_v35 = vand.u32 127, %v694_v32 }
 0x102   : > { %v591_v38 = vadd.f32 %v589_v29, %v577_v33  ;;  %v592_v39 = vadd.f32 %v590_v30, %v578_v34 }
 0x103   : > { %vm745_vm0 = vcmp.lt.s32.totalorder %v2664_v35, 111  ;;  %vm724_vm1 = vcmp.lt.s32.totalorder %v2664_v35, 127  ;;  %vm738_vm3 = vcmp.lt.s32.totalorder %v2664_v35, 112  ;;  %vm731_vm4 = vcmp.lt.s32.totalorder %v2664_v35, 113 }
 0x104   : > { %v605_v46 = vadd.f32 %v603_v40, %v591_v38  ;;  %v606_v47 = vadd.f32 %v604_v41, %v592_v39  ;;  %vm717_vm6 = vcmp.lt.s32.totalorder %v2664_v35, 1  ;;  %vm710_vm7 = vcmp.lt.s32.totalorder %v2664_v35, 15 }
 0x105   : > { %vm703_vm8 = vcmp.lt.s32.totalorder %v2664_v35, 16  ;;  %vm696_vm9 = vcmp.lt.s32.totalorder %v2664_v35, 17 }
 0x106   : > { %v609_v45 = vpop.permute.xlu1 %608 }
 0x107   : > { %v617_v48 = vmul.f32 %v615_v36, %v609_v45  ;;  %v618_v49 = vmul.f32 %v616_v37, %v609_v45  ;;  %v2668_v36 = vld [vmem:[#allocation13 + $0x40] sm:$0xf] }
 0x109   : > { %v619_v50 = vadd.f32 %v617_v48, %v605_v46  ;;  %v620_v51 = vadd.f32 %v618_v49, %v606_v47 }
 0x10b   : > { %v621_v53 = vmax.f32 %v619_v50, 0.0  ;;  %v622_v54 = vmax.f32 %v620_v51, 0.0 }
 0x10d   : > { %v627_v55 = vmul.f32 %v625_v52, %v621_v53  ;;  %v628_v56 = vmul.f32 %v625_v52, %v622_v54  ;;  %v2691_v53 = vld [vmem:[#allocation13 + $0x30] sm:$0xff] }
 0x10f   : > { %v631_v57 = vpop.permute.xlu1 %630  ;;  %v637_v58 = vrot.slane %v627_v55, 1  ;;  %v638_v59 = vrot.slane %v628_v56, 1  ;;  %v643_v0 = vrot.slane %v627_v55, 2  ;;  %v644_v1 = vrot.slane %v628_v56, 2 }
 0x110   : > { %v633_v60 = vadd.f32 %v631_v57, %v627_v55  ;;  %v634_v61 = vadd.f32 %v631_v57, %v628_v56  ;;  %v649_v6 = vrot.slane %v627_v55, 3  ;;  %v650_v7 = vrot.slane %v628_v56, 3 }
 0x112   : > { %v641_v62 = vadd.f32 %v637_v58, %v633_v60  ;;  %v642_v63 = vadd.f32 %v638_v59, %v634_v61 }
 0x114   : > { %v647_v3 = vadd.f32 %v643_v0, %v641_v62  ;;  %v648_v5 = vadd.f32 %v644_v1, %v642_v63  ;;  %v2708_v63 = vld [vmem:[#allocation13 + $0x48] sm:$0xf] }
 0x116   : > { %v653_v8 = vadd.f32 %v649_v6, %v647_v3  ;;  %v654_v9 = vadd.f32 %v650_v7, %v648_v5 }
 0x118   : > { %v655_v10 = vsub.f32 0.0, %v653_v8  ;;  %v656_v11 = vsub.f32 0.0, %v654_v9 }
 0x11a   : > { %v657_v12 = vmul.f32 1.442695, %v655_v10  ;;  %v659_v13 = vmul.f32 1.442695, %v656_v11 }
 0x11c   : > { %2064 = vpow2.f32 %v657_v12 }
 0x11d   : > { %2066 = vpow2.f32 %v659_v13 }
 0x122   : > { %v2065_v14 = vpop.eup %2064 }
 0x123   : > { %v2067_v15 = vpop.eup %2066  ;;  %v661_v18 = vadd.f32 1.0, %v2065_v14  ;;  %v2726_v14 = vld [vmem:[#allocation13 + $0x38] sm:$0xff] }
 0x124   : > { %v662_v19 = vadd.f32 1.0, %v2067_v15 }
 0x125   : > { %2068 = vrcp.f32 %v661_v18  ;;  %v2734_v18 = vld [vmem:[%s3140_s6] sm:$0xf] }
 0x126   : > { %2070 = vrcp.f32 %v662_v19 }
 0x12b   : > { %v2069_v20 = vpop.eup %2068 }
 0x12c   : > { %v2071_v21 = vpop.eup %2070  ;;  %v666_v16 = vperm.slane %v2069_v20, 0  ;;  %v2739_v20 = vld [vmem:[#allocation13 + $0x28] sm:$0xff] }
 0x12d   : > { %v667_v22 = vperm.slane %v2071_v21, 0 }
 0x12e   : > { %v674_v23 = vmul.f32 %v670_v43, %v666_v16 }
 0x12f   : > { %v675_v24 = vmul.f32 %v671_v44, %v667_v22 }
 0x130   : > { %v680_v26 = vadd.f32 %v678_v17, %v674_v23 }
 0x131   : > { %v681_v28 = vadd.f32 %v678_v17, %v675_v24  ;;  %v797_v24 = vsel %vm795_vm5, %v2734_v18, 0 }
 0x132   : > { %v688_v29 = vmul.f32 %v684_v25, %v680_v26  ;;  %v2762_v32 = vand.u32 4294901760, %v797_v24 }
 0x133   : > { %v2636_v30 = vmul.f32 %v685_v27, %v681_v28 }
 0x134   : > { %741 = vrot.lane.b32.xlu2 %v688_v29, %s2380_s9  ;;  %734 = vrot.lane.b32.xlu0 %v688_v29, %s2381_s17 }
 0x135   : > { %736 = vrot.lane.b32.xlu1 %v2636_v30, %s2381_s17 }
 0x13c   : > { %722 = vrot.lane.b32.xlu2 %v2636_v30, %s2382_s3  ;;  %743 = vrot.lane.b32.xlu0 %v2636_v30, %s2380_s9 }
 0x13d   : > { %720 = vrot.lane.b32.xlu1 %v688_v29, %s2382_s3 }
 0x144   : > { %713 = vrot.lane.b32.xlu2 %v688_v29, %s2383_s21  ;;  %727 = vrot.lane.b32.xlu0 %v688_v29, %s2384_s29 }
 0x145   : > { %729 = vrot.lane.b32.xlu1 %v2636_v30, %s2384_s29 }
 0x14c   : > { %701 = vrot.lane.b32.xlu2 %v2636_v30, %s2385_s5  ;;  %715 = vrot.lane.b32.xlu0 %v2636_v30, %s2383_s21 }
 0x14d   : > { %699 = vrot.lane.b32.xlu1 %v688_v29, %s2385_s5 }
 0x154   : > { %690 = vrot.lane.b32.xlu2 %v688_v29, %s2386_s26  ;;  %706 = vrot.lane.b32.xlu0 %v688_v29, %s2387_s16 }
 0x155   : > { %708 = vrot.lane.b32.xlu1 %v2636_v30, %s2387_s16 }
 0x15c   : > { %692 = vrot.lane.b32.xlu0 %v2636_v30, %s2386_s26 }
 0x15d   : > { %792 = vperm.xlu1 %2060, %v2624_v4  }
 0x165   : > { %2061 = vset.pattern.permute.xlu1 %v2370_v2 }
 0x18e   : > { %v742_v31 = vpop.permute.xlu2 %741 }
 0x196   : > { %v723_v38 = vpop.permute.xlu2 %722 }
 0x19e   : > { %v714_v59 = vpop.permute.xlu2 %713 }
 0x1a6   : > { %v735_v33 = vpop.permute.xlu0 %734  ;;  %v702_v25 = vpop.permute.xlu2 %701 }
 0x1a7   : > { %v737_v34 = vpop.permute.xlu1 %736 }
 0x1a8   : > { %v739_v47 = vsel %vm738_vm3, %v735_v33, %v737_v34  ;;  %v740_v60 = vsel %vm738_vm3, %v737_v34, %v735_v33 }
 0x1a9   : > { %v768_v51 = vrot.slane %v739_v47, 4  ;;  %v769_v7 = vrot.slane %v740_v60, 4 }
 0x1ae   : > { %v744_v37 = vpop.permute.xlu0 %743 }
 0x1af   : > { %v721_v39 = vpop.permute.xlu1 %720  ;;  %v746_v40 = vsel %vm745_vm0, %v742_v31, %v744_v37  ;;  %v747_v0 = vsel %vm745_vm0, %v744_v37, %v742_v31 }
 0x1b0   : > { %v725_v2 = vsel %vm724_vm1, %v721_v39, %v723_v38  ;;  %v789_v41 = vmul.f32 %v746_v40, %v2668_v36  ;;  %v726_v62 = vsel %vm724_vm1, %v723_v38, %v721_v39  ;;  %v790_v9 = vmul.f32 %v747_v0, %v2708_v63  ;;  %v2766_v39 = vld [vmem:[#allocation13 + $0x10] sm:$0xff]  ;;  %v2768_v40 = vld [vmem:[#allocation13 + $0x18] sm:$0xff]  ;;  %v691_v0 = vpop.permute.xlu2 %690 }
 0x1b1   : > { %v762_v43 = vrot.slane %v725_v2, 4  ;;  %v763_v8 = vrot.slane %v726_v62, 4 }
 0x1b2   : > { %v800_v44 = vsel %vm772_vm2, %v789_v41, 0  ;;  %v803_v16 = vsel %vm772_vm2, %v790_v9, 0 }
 0x1b3   : > { %v777_v45 = vsel %vm772_vm2, %v688_v29, %v762_v43  ;;  %v2680_v46 = vand.u32 4294901760, %v800_v44  ;;  %v778_v21 = vsel %vm772_vm2, %v2636_v30, %v763_v8  ;;  %v2759_v29 = vand.u32 4294901760, %v803_v16  ;;  %v2807_v8 = vld [vmem:[#allocation13 + $0x8] sm:$0xff] }
 0x1b4   : > { %v785_v48 = vmul.f32 %v777_v45, %v2676_v42  ;;  %v786_v28 = vmul.f32 %v778_v21, %v2739_v20 }
 0x1b5   : > { %817 = vmatpush.msra.mxu0 %v2680_v46  ;;  %925 = vmatpush.msra.mxu3 %v2680_v46  ;;  %v2689_v49 = vsub.f32 %v800_v44, %v2680_v46  ;;  %v2778_v45 = vsub.f32 %v803_v16, %v2759_v29 }
 0x1b6   : > { %v728_v50 = vpop.permute.xlu0 %727  ;;  %v2695_v55 = vand.u32 4294901760, %v785_v48  ;;  %v2775_v44 = vand.u32 4294901760, %v786_v28 }
 0x1b7   : > { %v730_v52 = vpop.permute.xlu1 %729  ;;  %894 = vmatpush.msra.mxu2 %v2689_v49  ;;  %v848_v54 = vand.u32 4294901760, %v2689_v49 }
 0x1b8   : > { %v732_v56 = vsel %vm731_vm4, %v728_v50, %v730_v52  ;;  %v2713_v3 = vsub.f32 %v785_v48, %v2695_v55  ;;  %v733_v6 = vsel %vm731_vm4, %v730_v52, %v728_v50  ;;  %v2785_v52 = vsub.f32 %v797_v24, %v2762_v32 }
 0x1b9   : > { %v779_v57 = vsel %vm772_vm2, %v732_v56, %v768_v51  ;;  %v849_v58 = vsub.f32 %v2689_v49, %v848_v54  ;;  %v780_v15 = vsel %vm772_vm2, %v733_v6, %v769_v7  ;;  %v2801_v62 = vsub.f32 %v786_v28, %v2775_v44  ;;  %v2805_v7 = vld [vmem:[#allocation13] sm:$0xff] }
 0x1ba   : > { %v787_v61 = vmul.f32 %v779_v57, %v2691_v53  ;;  %v860_v13 = vand.u32 4294901760, %v2713_v3  ;;  %v788_v17 = vmul.f32 %v780_v15, %v2726_v14 }
 0x1bb   : > { %v850_v1 = vand.u32 4294901760, %v849_v58  ;;  %v1058_v28 = vand.u32 4294901760, %v2801_v62 }
 0x1bc   : > { %v2715_v5 = vand.u32 4294901760, %v787_v61  ;;  %v861_v23 = vsub.f32 %v2713_v3, %v860_v13  ;;  %v2764_v33 = vand.u32 4294901760, %v788_v17 }
 0x1bd   : > { %851 = vmatpush.msra.mxu1 %v850_v1 }
 0x1be   : > { %819 = vmatpush.msra.mxu0 %v2715_v5  ;;  %927 = vmatpush.msra.mxu3 %v2715_v5  ;;  %v716_v10 = vpop.permute.xlu0 %715  ;;  %v2723_v11 = vsub.f32 %v787_v61, %v2715_v5  ;;  %v862_v2 = vand.u32 4294901760, %v861_v23  ;;  %v2792_v58 = vsub.f32 %v788_v17, %v2764_v33  ;;  %v1046_v61 = vand.u32 4294901760, %v2778_v45 }
 0x1bf   : > { %v700_v12 = vpop.permute.xlu1 %699  ;;  %v718_v26 = vsel %vm717_vm6, %v714_v59, %v716_v10  ;;  %v719_v27 = vsel %vm717_vm6, %v716_v10, %v714_v59 }
 0x1c0   : > { %821 = vmatpush.msra.mxu0 %v2695_v55  ;;  %897 = vmatpush.msra.mxu2 %v2723_v11  ;;  %v854_v19 = vand.u32 4294901760, %v2723_v11  ;;  %v756_v34 = vrot.slane %v719_v27, 4  ;;  %v757_v37 = vrot.slane %v718_v26, 4  ;;  %v704_v56 = vsel %vm703_vm8, %v700_v12, %v702_v25 }
 0x1c1   : > { %929 = vmatpush.msra.mxu3 %v2695_v55  ;;  %v705_v57 = vsel %vm703_vm8, %v702_v25, %v700_v12  ;;  %v751_v6 = vrot.slane %v704_v56, 4  ;;  %v2811_v12 = vand.u32 4294901760, %v2785_v52  ;;  %v1052_v16 = vand.u32 4294901760, %v2792_v58 }
 0x1c2   : > { %900 = vmatpush.msra.mxu2 %v2713_v3  ;;  %v855_v22 = vsub.f32 %v2723_v11, %v854_v19  ;;  %v750_v1 = vrot.slane %v705_v57, 4  ;;  %v1047_v27 = vsub.f32 %v2778_v45, %v1046_v61 }
 0x1c4   : > { %v856_v30 = vand.u32 4294901760, %v855_v22 }
 0x1c6   : > { %v707_v31 = vpop.permute.xlu0 %706  ;;  %857 = vmatpush.msra.mxu1 %v856_v30 }
 0x1c7   : > { %v709_v38 = vpop.permute.xlu1 %708 }
 0x1c8   : > { %v711_v41 = vsel %vm710_vm7, %v707_v31, %v709_v38  ;;  %v712_v43 = vsel %vm710_vm7, %v709_v38, %v707_v31  ;;  %863 = vmatpush.msra.mxu1 %v862_v2  ;;  %v829_v31 = vsub.f32 %v2785_v52, %v2811_v12  ;;  %v1053_v38 = vsub.f32 %v2792_v58, %v1052_v16 }
 0x1c9   : > { %v775_v47 = vsel %vm772_vm2, %v712_v43, %v756_v34  ;;  %v776_v48 = vsel %vm772_vm2, %v711_v41, %v757_v37  ;;  %v1048_v43 = vand.u32 4294901760, %v1047_v27 }
 0x1ca   : > { %v783_v50 = vmul.f32 %v775_v47, %v2766_v39  ;;  %v784_v51 = vmul.f32 %v776_v48, %v2768_v40  ;;  %v1059_v48 = vsub.f32 %v2801_v62, %v1058_v28  ;;  %v1054_v56 = vand.u32 4294901760, %v1053_v38 }
 0x1cc   : > { %v2794_v59 = vand.u32 4294901760, %v783_v50  ;;  %v2796_v60 = vand.u32 4294901760, %v784_v51 }
 0x1ce   : > { %823 = vmatpush.msra.mxu0 %v2794_v59  ;;  %931 = vmatpush.msra.mxu3 %v2794_v59  ;;  %v693_v9 = vpop.permute.xlu0 %692  ;;  %v865_v10 = vsub.f32 %v783_v50, %v2794_v59  ;;  %v2819_v17 = vsub.f32 %v784_v51, %v2796_v60  ;;  %v830_v51 = vand.u32 4294901760, %v829_v31 }
 0x1cf   : > { %v697_v15 = vsel %vm696_vm9, %v691_v0, %v693_v9  ;;  %v698_v21 = vsel %vm696_vm9, %v693_v9, %v691_v0 }
 0x1d0   : > { %v773_v22 = vsel %vm772_vm2, %v698_v21, %v750_v1  ;;  %v774_v23 = vsel %vm772_vm2, %v697_v15, %v751_v6  ;;  %903 = vmatpush.msra.mxu2 %v865_v10  ;;  %v866_v24 = vand.u32 4294901760, %v865_v10  ;;  %v1064_v2 = vand.u32 4294901760, %v2819_v17 }
 0x1d1   : > { %v781_v25 = vmul.f32 %v773_v22, %v2805_v7  ;;  %v782_v26 = vmul.f32 %v774_v23, %v2807_v8  ;;  %v1060_v6 = vand.u32 4294901760, %v1059_v48 }
 0x1d2   : > { %v867_v30 = vsub.f32 %v865_v10, %v866_v24  ;;  %v1065_v57 = vsub.f32 %v2819_v17, %v1064_v2 }
 0x1d3   : > { %v824_v34 = vand.u32 4294901760, %v781_v25  ;;  %v2831_v37 = vand.u32 4294901760, %v782_v26 }
 0x1d4   : > { %v868_v41 = vand.u32 4294901760, %v867_v30 }
 0x1d5   : > { %825 = vmatpush.msra.mxu0 %v824_v34  ;;  %933 = vmatpush.msra.mxu3 %v824_v34  ;;  %v871_v47 = vsub.f32 %v781_v25, %v824_v34  ;;  %v1069_v50 = vsub.f32 %v782_v26, %v2831_v37 }
 0x1d6   : > { %869 = vmatpush.msra.mxu1 %v868_v41  ;;  %831 = vmatmul.f32.vlgmr.msra.gmra.mxu0 %v830_v51 }
 0x1d7   : > { %955 = vmatpush.msrb.mxu0 %v848_v54  ;;  %1049 = vmatpush.msrb.mxu3 %v1048_v43  ;;  %v872_v0 = vand.u32 4294901760, %v871_v47  ;;  %v1070_v1 = vand.u32 4294901760, %v1069_v50  ;;  %v1066_v54 = vand.u32 4294901760, %v1065_v57 }
 0x1d8   : > { %906 = vmatpush.msra.mxu2 %v871_v47  ;;  %937 = vmatmul.f32.vlgmr.msra.gmra.mxu3 %v2811_v12 }
 0x1d9   : > { %959 = vmatpush.msrb.mxu0 %v854_v19  ;;  %1055 = vmatpush.msrb.mxu3 %v1054_v56  ;;  %v873_v9 = vsub.f32 %v871_v47, %v872_v0  ;;  %v1071_v49 = vsub.f32 %v1069_v50, %v1070_v1 }
 0x1da   : > { %1015 = vmatpush.msrb.mxu2 %v2759_v29 }
 0x1db   : > { %909 = vmatmul.f32.vlgmr.msra.gmra.mxu2 %v2785_v52  ;;  %963 = vmatpush.msrb.mxu0 %v860_v13  ;;  %v874_v10 = vand.u32 4294901760, %v873_v9  ;;  %v1072_v11 = vand.u32 4294901760, %v1071_v49 }
 0x1dc   : > { %1017 = vmatpush.msrb.mxu2 %v2764_v33  ;;  %1061 = vmatpush.msrb.mxu3 %v1060_v6 }
 0x1dd   : > { %967 = vmatpush.msrb.mxu0 %v866_v24  ;;  %875 = vmatpush.msra.mxu1 %v874_v10 }
 0x1de   : > { %1019 = vmatpush.msrb.mxu2 %v2775_v44  ;;  %1067 = vmatpush.msrb.mxu3 %v1066_v54 }
 0x1df   : > { %971 = vmatpush.msrb.mxu0 %v872_v0  ;;  %989 = vmatpush.msrb.mxu1 %v2680_v46  ;;  %v793_v46 = vpop.permute.xlu1 %792 }
 0x1e0   : > { %1021 = vmatpush.msrb.mxu2 %v2796_v60  ;;  %1073 = vmatpush.msrb.mxu3 %v1072_v11 }
 0x1e1   : > { %877 = vmatmul.f32.vlgmr.msra.gmra.mxu1 %v2762_v32  ;;  %1092 = vmatpush.msra.mxu0 %v2778_v45 }
 0x1e2   : > { %1187 = vmatpush.msra.mxu3 %v2759_v29  ;;  %991 = vmatpush.msrb.mxu1 %v2715_v5 }
 0x1e3   : > { %1023 = vmatpush.msrb.mxu2 %v2831_v37  ;;  %1095 = vmatpush.msra.mxu0 %v2792_v58 }
 0x1e4   : > { %1029 = vmatmul.f32.vlgmr.msrb.gmra.mxu2 %v830_v51  ;;  %1189 = vmatpush.msra.mxu3 %v2764_v33 }
 0x1e5   : > { %1153 = vmatpush.msra.mxu2 %v1046_v61  ;;  %993 = vmatpush.msrb.mxu1 %v2695_v55 }
 0x1e6   : > { %973 = vmatmul.f32.vlgmr.msrb.gmra.mxu0 %v2762_v32  ;;  %1075 = vmatmul.f32.vlgmr.msrb.gmra.mxu3 %v2762_v32 }
 0x1e7   : > { %1098 = vmatpush.msra.mxu0 %v2801_v62  ;;  %1157 = vmatpush.msra.mxu2 %v1052_v16 }
 0x1e8   : > { %1191 = vmatpush.msra.mxu3 %v2775_v44  ;;  %995 = vmatpush.msrb.mxu1 %v2794_v59 }
 0x1e9   : > { %1101 = vmatpush.msra.mxu0 %v2819_v17  ;;  %1161 = vmatpush.msra.mxu2 %v1058_v28 }
 0x1ea   : > { %1193 = vmatpush.msra.mxu3 %v2796_v60  ;;  %997 = vmatpush.msrb.mxu1 %v824_v34 }
 0x1eb   : > { %1104 = vmatpush.msra.mxu0 %v1069_v50  ;;  %999 = vmatmul.f32.vlgmr.msrb.gmra.mxu1 %v2762_v32 }
 0x1ec   : > { %1165 = vmatpush.msra.mxu2 %v1064_v2  ;;  %1123 = vmatpush.msra.mxu1 %v2759_v29 }
 0x1ed   : > { %1195 = vmatpush.msra.mxu3 %v2831_v37 }
 0x1ee   : > { %1169 = vmatpush.msra.mxu2 %v1070_v1  ;;  %1107 = vmatmul.f32.vlgmr.msra.gmra.mxu0 %v2785_v52 }
 0x1ef   : > { %1125 = vmatpush.msra.mxu1 %v2764_v33  ;;  %1171 = vmatmul.f32.vlgmr.msra.gmra.mxu2 %v2762_v32 }
 0x1f0   : > { %1197 = vmatmul.f32.vlgmr.msra.gmra.mxu3 %v2762_v32 }
 0x1f1   : > { %1127 = vmatpush.msra.mxu1 %v2775_v44 }
 0x1f3   : > { %1129 = vmatpush.msra.mxu1 %v2796_v60 }
 0x1f5   : > { %1131 = vmatpush.msra.mxu1 %v2831_v37 }
 0x1f6   : > { %1135 = vmatmul.f32.vlgmr.msra.gmra.mxu1 %v2811_v12 }
 0x253   : > { %v832_v55 = vpop.f32.mrf.mxu0 }
 0x254   : > { %v833_v3 = vadd.f32 %v832_v55, %v793_v46 }
 0x25b   : > { %v938_v33 = vpop.f32.mrf.mxu3 }
 0x25e   : > { %v910_v5 = vpop.f32.mrf.mxu2  ;;  %v878_v13 = vpop.f32.mrf.mxu1 }
 0x25f   : > { %v879_v19 = vadd.f32 %v878_v13, %v833_v3 }
 0x261   : > { %v911_v29 = vadd.f32 %v910_v5, %v879_v19 }
 0x263   : > { %v939_v45 = vadd.f32 %v938_v33, %v911_v29  ;;  %v974_v52 = vpop.f32.mrf.mxu0 }
 0x265   : > { %v975_v58 = vadd.f32 %v974_v52, %v939_v45 }
 0x267   : > { %v1030_v32 = vpop.f32.mrf.mxu2 }
 0x268   : > { %v1000_v59 = vpop.f32.mrf.mxu1  ;;  %v1031_v61 = vadd.f32 %v1030_v32, %v793_v46 }
 0x269   : > { %v1001_v44 = vadd.f32 %v1000_v59, %v975_v58  ;;  %v1076_v60 = vpop.f32.mrf.mxu3 }
 0x26a   : > { %v1077_v15 = vadd.f32 %v1076_v60, %v1031_v61 }
 0x26b   : > { %v1201_v62 = vmax.f32 %v1001_v44, 0.0  ;;  %v1108_v12 = vpop.f32.mrf.mxu0 }
 0x26c   : > { %v1109_v21 = vadd.f32 %v1108_v12, %v1077_v15 }
 0x26d   : > { %1227 = vrot.lane.b32.xlu0 %v1201_v62, %s2382_s3  ;;  %1245 = vrot.lane.b32.xlu1 %v1201_v62, %s2380_s9 }
 0x26e   : > { %1239 = vrot.lane.b32.xlu2 %v1201_v62, %s2381_s17 }
 0x272   : > { %v1172_v17 = vpop.f32.mrf.mxu2 }
 0x273   : > { %v1136_v16 = vpop.f32.mrf.mxu1  ;;  %v1198_v23 = vpop.f32.mrf.mxu3 }
 0x274   : > { %v1137_v22 = vadd.f32 %v1136_v16, %v1109_v21 }
 0x275   : > { %1209 = vrot.lane.b32.xlu0 %v1201_v62, %s2385_s5  ;;  %1221 = vrot.lane.b32.xlu1 %v1201_v62, %s2383_s21 }
 0x276   : > { %v1173_v24 = vadd.f32 %v1172_v17, %v1137_v22  ;;  %1233 = vrot.lane.b32.xlu2 %v1201_v62, %s2384_s29 }
 0x278   : > { %v1199_v25 = vadd.f32 %v1198_v23, %v1173_v24 }
 0x27a   : > { %v1202_v26 = vmax.f32 %v1199_v25, 0.0 }
 0x27d   : > { %1229 = vrot.lane.b32.xlu1 %v1202_v26, %s2382_s3  ;;  %1241 = vrot.lane.b32.xlu0 %v1202_v26, %s2381_s17 }
 0x27e   : > { %1215 = vrot.lane.b32.xlu2 %v1201_v62, %s2387_s16 }
 0x285   : > { %1211 = vrot.lane.b32.xlu1 %v1202_v26, %s2385_s5  ;;  %1235 = vrot.lane.b32.xlu0 %v1202_v26, %s2384_s29 }
 0x286   : > { %1247 = vrot.lane.b32.xlu2 %v1202_v26, %s2380_s9 }
 0x28d   : > { %1203 = vrot.lane.b32.xlu1 %v1201_v62, %s2386_s26  ;;  %1217 = vrot.lane.b32.xlu0 %v1202_v26, %s2387_s16 }
 0x28e   : > { %1223 = vrot.lane.b32.xlu2 %v1202_v26, %s2383_s21 }
 0x295   : > { %1297 = vrot.lane.b32.xlu0 %v2734_v18, %s2388_s27  ;;  %1294 = vperm.xlu1 %2061, %v2624_v4  }
 0x296   : > { %1205 = vrot.lane.b32.xlu2 %v1202_v26, %s2386_s26 }
 0x29d   : > { %1712 = vperm.xlu0 %2063, %v2624_v4  }
 0x29e   : > { %1706 = vperm.xlu2 %2062, %v2624_v4  }
 0x2c8   : > { %v1240_v27 = vpop.permute.xlu2 %1239 }
 0x2d0   : > { %v1234_v28 = vpop.permute.xlu2 %1233 }
 0x2d8   : > { %v2903_v30 = vpop.permute.xlu2 %1215 }
 0x2df   : > { %v1228_v31 = vpop.permute.xlu0 %1227  ;;  %v1246_v34 = vpop.permute.xlu1 %1245 }
 0x2e0   : > { %v1248_v37 = vpop.permute.xlu2 %1247 }
 0x2e1   : > { %v1249_v38 = vsel %vm745_vm0, %v1246_v34, %v1248_v37 }
 0x2e2   : > { %v1291_v18 = vmul.f32 %v1249_v38, %v2668_v36  ;;  %v1250_v36 = vsel %vm745_vm0, %v1248_v37, %v1246_v34 }
 0x2e3   : > { %v1292_v56 = vmul.f32 %v1250_v36, %v2708_v63 }
 0x2e4   : > { %v1302_v2 = vsel %vm772_vm2, %v1291_v18, 0 }
 0x2e5   : > { %v2909_v41 = vand.u32 4294901760, %v1302_v2  ;;  %v1305_v54 = vsel %vm772_vm2, %v1292_v56, 0 }
 0x2e6   : > { %v2936_v5 = vand.u32 4294901760, %v1305_v54 }
 0x2e7   : > { %v2912_v43 = vsub.f32 %v1302_v2, %v2909_v41  ;;  %1319 = vmatpush.msrb.mxu0 %v2909_v41  ;;  %1427 = vmatpush.msrb.mxu3 %v2909_v41  ;;  %v1210_v4 = vpop.permute.xlu0 %1209  ;;  %v1222_v47 = vpop.permute.xlu1 %1221 }
 0x2e8   : > { %v1224_v11 = vpop.permute.xlu2 %1223  ;;  %v2946_v32 = vsub.f32 %v1305_v54, %v2936_v5 }
 0x2e9   : > { %1396 = vmatpush.msrb.mxu2 %v2912_v43  ;;  %v1350_v48 = vand.u32 4294901760, %v2912_v43 }
 0x2eb   : > { %v1351_v50 = vsub.f32 %v2912_v43, %v1350_v48 }
 0x2ed   : > { %v1352_v51 = vand.u32 4294901760, %v1351_v50 }
 0x2ef   : > { %1353 = vmatpush.msrb.mxu1 %v1352_v51  ;;  %v1230_v57 = vpop.permute.xlu1 %1229  ;;  %v1242_v0 = vpop.permute.xlu0 %1241 }
 0x2f0   : > { %v1231_v1 = vsel %vm724_vm1, %v1228_v31, %v1230_v57  ;;  %v1232_v6 = vsel %vm724_vm1, %v1230_v57, %v1228_v31  ;;  %v1243_v55 = vsel %vm738_vm3, %v1240_v27, %v1242_v0  ;;  %v1244_v3 = vsel %vm738_vm3, %v1242_v0, %v1240_v27  ;;  %v1206_v24 = vpop.permute.xlu2 %1205 }
 0x2f1   : > { %v1265_v9 = vrot.slane %v1231_v1, 4  ;;  %v1266_v49 = vrot.slane %v1232_v6, 4  ;;  %v1271_v19 = vrot.slane %v1243_v55, 4  ;;  %v1272_v29 = vrot.slane %v1244_v3, 4 }
 0x2f3   : > { %v1279_v10 = vsel %vm772_vm2, %v1201_v62, %v1265_v9  ;;  %v1280_v46 = vsel %vm772_vm2, %v1202_v26, %v1266_v49  ;;  %v1226_v62 = vsel %vm717_vm6, %v1224_v11, %v1222_v47 }
 0x2f4   : > { %v1287_v63 = vmul.f32 %v1279_v10, %v2676_v42  ;;  %v1288_v13 = vmul.f32 %v1280_v46, %v2739_v20  ;;  %v1225_v20 = vsel %vm717_vm6, %v1222_v47, %v1224_v11 }
 0x2f5   : > { %v1260_v23 = vrot.slane %v1225_v20, 4 }
 0x2f6   : > { %v2939_v52 = vand.u32 4294901760, %v1287_v63  ;;  %v2956_v15 = vand.u32 4294901760, %v1288_v13 }
 0x2f7   : > { %v1212_v33 = vpop.permute.xlu1 %1211  ;;  %v1236_v45 = vpop.permute.xlu0 %1235 }
 0x2f8   : > { %v1237_v58 = vsel %vm731_vm4, %v1234_v28, %v1236_v45  ;;  %v1238_v42 = vsel %vm731_vm4, %v1236_v45, %v1234_v28  ;;  %v1214_v12 = vsel %vm703_vm8, %v1212_v33, %v1210_v4  ;;  %v2961_v21 = vsub.f32 %v1287_v63, %v2939_v52 }
 0x2f9   : > { %v1281_v59 = vsel %vm772_vm2, %v1237_v58, %v1271_v19  ;;  %v1282_v44 = vsel %vm772_vm2, %v1238_v42, %v1272_v29  ;;  %v1213_v16 = vsel %vm703_vm8, %v1210_v4, %v1212_v33  ;;  %v1253_v25 = vrot.slane %v1214_v12, 4 }
 0x2fa   : > { %v1289_v61 = vmul.f32 %v1281_v59, %v2691_v53  ;;  %v1290_v60 = vmul.f32 %v1282_v44, %v2726_v14  ;;  %v1548_v53 = vand.u32 4294901760, %v2946_v32  ;;  %v1259_v14 = vrot.slane %v1226_v62, 4 }
 0x2fb   : > { %v1254_v27 = vrot.slane %v1213_v16, 4  ;;  %v1362_v37 = vand.u32 4294901760, %v2961_v21  ;;  %v2980_v38 = vsub.f32 %v1288_v13, %v2956_v15 }
 0x2fc   : > { %v2965_v17 = vand.u32 4294901760, %v1289_v61  ;;  %v2967_v22 = vand.u32 4294901760, %v1290_v60  ;;  %v1549_v6 = vsub.f32 %v2946_v32, %v1548_v53 }
 0x2fd   : > { %v1363_v54 = vsub.f32 %v2961_v21, %v1362_v37  ;;  %v1560_v10 = vand.u32 4294901760, %v2980_v38 }
 0x2fe   : > { %1321 = vmatpush.msrb.mxu0 %v2965_v17  ;;  %1429 = vmatpush.msrb.mxu3 %v2965_v17  ;;  %v2973_v26 = vsub.f32 %v1289_v61, %v2965_v17  ;;  %v2976_v28 = vsub.f32 %v1290_v60, %v2967_v22  ;;  %v1550_v33 = vand.u32 4294901760, %v1549_v6 }
 0x2ff   : > { %v1204_v31 = vpop.permute.xlu1 %1203  ;;  %v1218_v34 = vpop.permute.xlu0 %1217  ;;  %v1364_v59 = vand.u32 4294901760, %v1363_v54  ;;  %v1561_v44 = vsub.f32 %v2980_v38, %v1560_v10 }
 0x300   : > { %v1207_v18 = vsel %vm696_vm9, %v1204_v31, %v1206_v24  ;;  %v1208_v2 = vsel %vm696_vm9, %v1206_v24, %v1204_v31  ;;  %v1219_v4 = vsel %vm710_vm7, %v2903_v30, %v1218_v34  ;;  %v1220_v47 = vsel %vm710_vm7, %v1218_v34, %v2903_v30  ;;  %1323 = vmatpush.msrb.mxu0 %v2939_v52 }
 0x301   : > { %v1275_v36 = vsel %vm772_vm2, %v1208_v2, %v1253_v25  ;;  %v1276_v50 = vsel %vm772_vm2, %v1207_v18, %v1254_v27  ;;  %v1277_v51 = vsel %vm772_vm2, %v1220_v47, %v1259_v14  ;;  %v1278_v56 = vsel %vm772_vm2, %v1219_v4, %v1260_v23  ;;  %1399 = vmatpush.msrb.mxu2 %v2973_v26 }
 0x302   : > { %v1283_v57 = vmul.f32 %v1275_v36, %v2805_v7  ;;  %v1284_v0 = vmul.f32 %v1276_v50, %v2807_v8  ;;  %v1285_v1 = vmul.f32 %v1277_v51, %v2766_v39  ;;  %v1286_v35 = vmul.f32 %v1278_v56, %v2768_v40  ;;  %1431 = vmatpush.msrb.mxu3 %v2939_v52 }
 0x303   : > { %1402 = vmatpush.msrb.mxu2 %v2961_v21  ;;  %v1356_v30 = vand.u32 4294901760, %v2973_v26  ;;  %v1554_v9 = vand.u32 4294901760, %v2976_v28 }
 0x304   : > { %v3009_v49 = vand.u32 4294901760, %v1283_v57  ;;  %v3011_v7 = vand.u32 4294901760, %v1284_v0  ;;  %v3013_v8 = vand.u32 4294901760, %v1285_v1  ;;  %v3015_v39 = vand.u32 4294901760, %v1286_v35 }
 0x305   : > { %v1357_v40 = vsub.f32 %v2973_v26, %v1356_v30  ;;  %v1555_v19 = vsub.f32 %v2976_v28, %v1554_v9 }
 0x306   : > { %v3023_v11 = vsub.f32 %v1284_v0, %v3011_v7  ;;  %v3026_v46 = vsub.f32 %v1286_v35, %v3015_v39  ;;  %1325 = vmatpush.msrb.mxu0 %v3013_v8  ;;  %1433 = vmatpush.msrb.mxu3 %v3013_v8  ;;  %v1367_v63 = vsub.f32 %v1285_v1, %v3013_v8 }
 0x307   : > { %v1358_v55 = vand.u32 4294901760, %v1357_v40  ;;  %v1298_v3 = vpop.permute.xlu0 %1297  ;;  %v1373_v13 = vsub.f32 %v1283_v57, %v3009_v49  ;;  %v1556_v16 = vand.u32 4294901760, %v1555_v19 }
 0x308   : > { %v1299_v29 = vsel %vm795_vm5, %v1298_v3, 0  ;;  %1327 = vmatpush.msrb.mxu0 %v3009_v49  ;;  %1405 = vmatpush.msrb.mxu2 %v1367_v63  ;;  %v1368_v45 = vand.u32 4294901760, %v1367_v63  ;;  %v1566_v58 = vand.u32 4294901760, %v3026_v46  ;;  %v1572_v62 = vand.u32 4294901760, %v3023_v11 }
 0x309   : > { %1359 = vmatpush.msrb.mxu1 %v1358_v55  ;;  %v3038_v42 = vand.u32 4294901760, %v1299_v29  ;;  %1435 = vmatpush.msrb.mxu3 %v3009_v49  ;;  %v1374_v20 = vand.u32 4294901760, %v1373_v13 }
 0x30a   : > { %1457 = vmatpush.msra.mxu0 %v1350_v48  ;;  %v1369_v61 = vsub.f32 %v1367_v63, %v1368_v45  ;;  %v1567_v60 = vsub.f32 %v3026_v46, %v1566_v58  ;;  %1408 = vmatpush.msrb.mxu2 %v1373_v13  ;;  %v1562_v48 = vand.u32 4294901760, %v1561_v44  ;;  %v1573_v25 = vsub.f32 %v3023_v11, %v1572_v62 }
 0x30b   : > { %1551 = vmatpush.msra.mxu3 %v1550_v33  ;;  %v3051_v12 = vsub.f32 %v1299_v29, %v3038_v42  ;;  %1365 = vmatpush.msrb.mxu1 %v1364_v59  ;;  %v1375_v43 = vsub.f32 %v1373_v13, %v1374_v20 }
 0x30c   : > { %1461 = vmatpush.msra.mxu0 %v1356_v30  ;;  %1517 = vmatpush.msra.mxu2 %v2936_v5  ;;  %v1370_v14 = vand.u32 4294901760, %v1369_v61  ;;  %v1568_v24 = vand.u32 4294901760, %v1567_v60  ;;  %v1574_v34 = vand.u32 4294901760, %v1573_v25 }
 0x30d   : > { %1557 = vmatpush.msra.mxu3 %v1556_v16  ;;  %1411 = vmatmul.f32.vlgmr.msrb.gmra.mxu2 %v3051_v12  ;;  %v1330_v23 = vand.u32 4294901760, %v3051_v12  ;;  %v1376_v27 = vand.u32 4294901760, %v1375_v43 }
 0x30e   : > { %1465 = vmatpush.msra.mxu0 %v1362_v37  ;;  %1519 = vmatpush.msra.mxu2 %v2967_v22 }
 0x30f   : > { %1563 = vmatpush.msra.mxu3 %v1562_v48  ;;  %1371 = vmatpush.msrb.mxu1 %v1370_v14  ;;  %v1331_v26 = vsub.f32 %v3051_v12, %v1330_v23 }
 0x310   : > { %1439 = vmatmul.f32.vlgmr.msrb.gmra.mxu3 %v1330_v23  ;;  %1469 = vmatpush.msra.mxu0 %v1368_v45 }
 0x311   : > { %1521 = vmatpush.msra.mxu2 %v2956_v15  ;;  %1569 = vmatpush.msra.mxu3 %v1568_v24  ;;  %v1332_v31 = vand.u32 4294901760, %v1331_v26 }
 0x312   : > { %1377 = vmatpush.msrb.mxu1 %v1376_v27  ;;  %1473 = vmatpush.msra.mxu0 %v1374_v20 }
 0x313   : > { %1379 = vmatmul.f32.vlgmr.msrb.gmra.mxu1 %v3038_v42  ;;  %1523 = vmatpush.msra.mxu2 %v3015_v39 }
 0x314   : > { %1491 = vmatpush.msra.mxu1 %v2909_v41  ;;  %1575 = vmatpush.msra.mxu3 %v1574_v34  ;;  %v1295_v41 = vpop.permute.xlu1 %1294 }
 0x315   : > { %1333 = vmatmul.f32.vlgmr.msrb.gmra.mxu0 %v1332_v31  ;;  %1525 = vmatpush.msra.mxu2 %v3011_v7 }
 0x316   : > { %1689 = vmatpush.msrb.mxu3 %v2936_v5  ;;  %1493 = vmatpush.msra.mxu1 %v2965_v17 }
 0x317   : > { %1594 = vmatpush.msrb.mxu0 %v2946_v32  ;;  %1655 = vmatpush.msrb.mxu2 %v1548_v53 }
 0x318   : > { %1691 = vmatpush.msrb.mxu3 %v2967_v22  ;;  %1495 = vmatpush.msra.mxu1 %v2939_v52 }
 0x319   : > { %1531 = vmatmul.f32.vlgmr.msra.gmra.mxu2 %v1332_v31  ;;  %1597 = vmatpush.msrb.mxu0 %v2976_v28 }
 0x31a   : > { %1659 = vmatpush.msrb.mxu2 %v1554_v9  ;;  %1693 = vmatpush.msrb.mxu3 %v2956_v15  ;;  %v1707_v9 = vpop.permute.xlu2 %1706 }
 0x31b   : > { %1497 = vmatpush.msra.mxu1 %v3013_v8  ;;  %1577 = vmatmul.f32.vlgmr.msra.gmra.mxu3 %v3038_v42 }
 0x31c   : > { %1600 = vmatpush.msrb.mxu0 %v2980_v38  ;;  %1663 = vmatpush.msrb.mxu2 %v1560_v10 }
 0x31d   : > { %1695 = vmatpush.msrb.mxu3 %v3015_v39  ;;  %1499 = vmatpush.msra.mxu1 %v3009_v49 }
 0x31e   : > { %1603 = vmatpush.msrb.mxu0 %v3026_v46  ;;  %1501 = vmatmul.f32.vlgmr.msra.gmra.mxu1 %v3038_v42 }
 0x31f   : > { %1625 = vmatpush.msrb.mxu1 %v2936_v5  ;;  %1667 = vmatpush.msrb.mxu2 %v1566_v58 }
 0x320   : > { %1697 = vmatpush.msrb.mxu3 %v3011_v7  ;;  %1475 = vmatmul.f32.vlgmr.msra.gmra.mxu0 %v3038_v42 }
 0x321   : > { %1606 = vmatpush.msrb.mxu0 %v3023_v11  ;;  %1627 = vmatpush.msrb.mxu1 %v2967_v22 }
 0x322   : > { %1671 = vmatpush.msrb.mxu2 %v1572_v62 }
 0x323   : > { %1673 = vmatmul.f32.vlgmr.msrb.gmra.mxu2 %v3038_v42  ;;  %1629 = vmatpush.msrb.mxu1 %v2956_v15 }
 0x324   : > { %1699 = vmatmul.f32.vlgmr.msrb.gmra.mxu3 %v3038_v42 }
 0x325   : > { %1631 = vmatpush.msrb.mxu1 %v3015_v39  ;;  %v1713_v39 = vpop.permute.xlu0 %1712 }
 0x327   : > { %1633 = vmatpush.msrb.mxu1 %v3011_v7 }
 0x328   : > { %1609 = vmatmul.f32.vlgmr.msrb.gmra.mxu0 %v3051_v12  ;;  %1637 = vmatmul.f32.vlgmr.msrb.gmra.mxu1 %v1330_v23 }
 0x390   : > { %v1380_v5 = vpop.f32.mrf.mxu1  ;;  %v1412_v32 = vpop.f32.mrf.mxu2 }
 0x392   : > { %v1334_v52 = vpop.f32.mrf.mxu0 }
 0x393   : > { %v1335_v21 = vadd.f32 %v1334_v52, %v1295_v41  ;;  %v1440_v17 = vpop.f32.mrf.mxu3 }
 0x395   : > { %v1381_v22 = vadd.f32 %v1380_v5, %v1335_v21 }
 0x397   : > { %v1413_v53 = vadd.f32 %v1412_v32, %v1381_v22 }
 0x399   : > { %v1441_v38 = vadd.f32 %v1440_v17, %v1413_v53 }
 0x39b   : > { %v1502_v28 = vpop.f32.mrf.mxu1 }
 0x39c   : > { %v1532_v15 = vpop.f32.mrf.mxu2 }
 0x39d   : > { %v1476_v37 = vpop.f32.mrf.mxu0  ;;  %v1533_v18 = vadd.f32 %v1532_v15, %v1295_v41 }
 0x39e   : > { %v1578_v2 = vpop.f32.mrf.mxu3  ;;  %v1477_v4 = vadd.f32 %v1476_v37, %v1441_v38 }
 0x39f   : > { %v1579_v47 = vadd.f32 %v1578_v2, %v1533_v18 }
 0x3a0   : > { %v1503_v56 = vadd.f32 %v1502_v28, %v1477_v4 }
 0x3a2   : > { %v1703_v30 = vmax.f32 %v1503_v56, 0.0 }
 0x3a4   : > { %v1709_v7 = vmul.f32 %v1707_v9, %v1703_v30 }
 0x3a5   : > { %v1610_v36 = vpop.f32.mrf.mxu0  ;;  %v1638_v51 = vpop.f32.mrf.mxu1 }
 0x3a6   : > { %v1611_v50 = vadd.f32 %v1610_v36, %v1579_v47  ;;  %v1674_v0 = vpop.f32.mrf.mxu2  ;;  %v1715_v54 = vadd.f32 %v1713_v39, %v1709_v7 }
 0x3a7   : > { %v1700_v35 = vpop.f32.mrf.mxu3 }
 0x3a8   : > { %v1639_v57 = vadd.f32 %v1638_v51, %v1611_v50 }
 0x3aa   : > { %v1675_v1 = vadd.f32 %v1674_v0, %v1639_v57 }
 0x3ac   : > { %v1701_v6 = vadd.f32 %v1700_v35, %v1675_v1 }
 0x3ae   : > { %v1704_v49 = vmax.f32 %v1701_v6, 0.0 }
 0x3b0   : > { %v1710_v8 = vmul.f32 %v1707_v9, %v1704_v49 }
 0x3b2   : > { %v1716_v40 = vadd.f32 %v1713_v39, %v1710_v8 }
 0x3b4   : > { %v1719_v10 = vrot.slane %v1716_v40, 4 }
 0x3b6   : > { %v1720_v11 = vsel %vm772_vm2, %v1715_v54, %v1719_v10 }
 0x3b7   : > { %1722 = vst [vmem:[%s460_s10] sm:$0xff] %v1720_v11 }
 0x3b8   : > { %2309 = shalt.err (!%p2306_p11)
}
 0x3b9   : > { %1947 = dma.vmem_to_hbm [thread:$0]  (%p2509_p5), %s1738_s18, 128, %s1740_s13, %s1724_s12  }
 0x3ba PF: > { %s3176_s1 = sld [smem:[#allocation20_spill]]  ;;  %p3178_p13 = scmp.ge.s32.totalorder %s2360_s30, 2 }
 0x3bc   : > { %p1973_p3 = pnand %p3178_p13, %p2513_p4 }
 0x3be   : > { %p1974_p7 = pneg %p1973_p3 }
 0x3c0   : > { %s1751_s29 = sand.u32 1, %s3176_s1  }
 0x3c1   : > { %s1752_s5 = scalar_lea.sflag [#allocation4], %s1751_s29 }
 0x3c2   : > { %2343 = dma.done.wait (%p1974_p7), %s1752_s5, 128  }
 0x3c3   : > { %2345 = vsyncadd (%p1974_p7), %s1752_s5, 4294967168  ;;  %s3179_s30 = sld [smem:[#allocation22_spill]]  ;;  %s3182_s27 = smov %s2352_s28 }
 0x3c4   : > { %s3180_s26 = sld [smem:[#allocation21_spill]] }
 0x3c5   : > { %s3181_s29 = sld [smem:[#allocation23_spill]] }
 0x3c9   : > { %p26_p9 = scmp.ge.s32.totalorder %s3179_s30, 4  }
 0x3ca   : > { %s3183_s28 = smov %s3180_s26 }
 0x3cb   :  { %28 = sbr.rel (!%p26_p9) target bundleno = 15 (0xf), region = 137 }
 0x3d0   :  { %1758 = vsyncpa [#allocation3], 1 }
 0x3d1   :  { %1760 = vsyncpa [#allocation3 + $0x1], 1 }
 0x3d2   :  { %1761 = vsyncpa [#allocation6], 1 }
 0x3d3   :  { %1763 = vsyncpa [#allocation6 + $0x1], 1 }
 0x3d4   :  { %1764 = vsyncpa [#allocation9], 1 }
 0x3d5   :  { %1765 = vsyncpa [#allocation12], 1 }
 0x3d6   :  { %1766 = vsyncpa [#allocation4], 1 }
 0x3d7   :  { %1768 = vsyncpa [#allocation4 + $0x1], 1 }

</bundles_post_ra>
